<compile_context>
chip_gen: v7x
topology: tpu7x:2x2x1
jax: 0.10.0
libtpu: 0.0.40
codegen_flags: <defaults>
</compile_context>

<pallas_src>
import jax
import jax.numpy as jnp
from jax import lax
from jax.experimental import pallas as pl
from jax.experimental.pallas import tpu as pltpu

# ----------------------------- small ViT config ------------------------------
BATCH = 2
IN_C = 3
IMG = 16
PATCH = 8                        # -> 2x2 = 4 patches, seq_len = 5 (with cls token)
N_PATCH = (IMG // PATCH) ** 2    # 4
SEQ = N_PATCH + 1                # 5
HIDDEN = 32
HEADS = 4
HEAD_DIM = HIDDEN // HEADS
MLP_DIM = 64
LAYERS = 2
CLASSES = 10
LN_EPS = 1e-6                    # torchvision ViT uses LayerNorm(eps=1e-6)
CPP = IN_C * PATCH * PATCH       # flattened patch size = 192


# ------------------------------- fused kernel --------------------------------
def _vit_kernel(
    # embedding inputs / params (same block every grid step)
    patch_slab_ref, conv_w_ref, embed_bias_ref,
    # per-layer params (stacked along a leading LAYERS dim, indexed by grid step)
    ln1_g_ref, ln1_b_ref,
    w_qkv_ref, b_qkv_ref, w_o_ref, b_o_ref,
    ln2_g_ref, ln2_b_ref,
    w_fc1_ref, b_fc1_ref, w_fc2_ref, b_fc2_ref,
    # final norm + classifier head
    lnf_g_ref, lnf_b_ref, w_head_ref, b_head_ref,
    # output
    logits_ref,
    # VMEM scratch (persists across grid steps)
    tok_ref,
):
    layer = pl.program_id(0)
    scale = 1.0 / float(HEAD_DIM) ** 0.5

    def ln(x, g, b):
        mu = jnp.mean(x, axis=-1, keepdims=True)
        xc = x - mu
        var = jnp.mean(xc * xc, axis=-1, keepdims=True)
        return xc * lax.rsqrt(var + LN_EPS) * g + b

    # ---- grid step 0: patch embedding + class token + positional embedding ----
    # One M=(B*SEQ) matmul; cls rows of patch_slab are zero, and cls/pos/conv-bias
    # come in as a precomputed additive slab.  One dense store of the whole slab.
    @pl.when(layer == 0)
    def _():
        tok_ref[...] = (
            jnp.dot(patch_slab_ref[...], conv_w_ref[...],
                    preferred_element_type=jnp.float32)
            + embed_bias_ref[...])

    tok = tok_ref[...]                                  # single resident-slab load per layer

    # ------------------- multi-head self-attention block -------------------
    y = ln(tok, ln1_g_ref[0], ln1_b_ref[0])                                   # (B*SEQ, H)
    qkv = (jnp.dot(y, w_qkv_ref[0], preferred_element_type=jnp.float32)
           + b_qkv_ref[0])                                                    # (B*SEQ, 3H)

    per_batch = []
    for b in range(BATCH):
        r = b * SEQ
        q_b = qkv[r:r + SEQ, 0 * HIDDEN:1 * HIDDEN]
        k_b = qkv[r:r + SEQ, 1 * HIDDEN:2 * HIDDEN]
        v_b = qkv[r:r + SEQ, 2 * HIDDEN:3 * HIDDEN]
        heads = []
        for h in range(HEADS):
            c0 = h * HEAD_DIM
            qh = q_b[:, c0:c0 + HEAD_DIM]
            kh = k_b[:, c0:c0 + HEAD_DIM]
            vh = v_b[:, c0:c0 + HEAD_DIM]
            s = lax.dot_general(qh, kh, (((1,), (1,)), ((), ())),
                                preferred_element_type=jnp.float32) * scale   # (SEQ, SEQ)
            m = jnp.max(s, axis=-1, keepdims=True)
            p = jnp.exp(s - m)
            inv = pl.reciprocal(jnp.sum(p, axis=-1, keepdims=True), approx=True)
            p = p * inv
            heads.append(jnp.dot(p, vh, preferred_element_type=jnp.float32))  # (SEQ, Dh)
        per_batch.append(jnp.concatenate(heads, axis=-1))                     # (SEQ, H)
    attn_in = jnp.concatenate(per_batch, axis=0)                              # (B*SEQ, H)

    attn_out = (jnp.dot(attn_in, w_o_ref[0], preferred_element_type=jnp.float32)
                + b_o_ref[0])
    tok = tok + attn_out                                                      # residual

    # ------------------------------ MLP block ------------------------------
    y2 = ln(tok, ln2_g_ref[0], ln2_b_ref[0])
    h1 = jnp.dot(y2, w_fc1_ref[0], preferred_element_type=jnp.float32) + b_fc1_ref[0]
    h1 = 0.5 * h1 * (1.0 + lax.erf(h1 * 0.7071067811865476))   # exact GELU (approximate='none')
    h2 = jnp.dot(h1, w_fc2_ref[0], preferred_element_type=jnp.float32) + b_fc2_ref[0]
    tok = tok + h2                                                            # residual
    tok_ref[...] = tok                                                        # single slab store

    # ---- last grid step: final LayerNorm (cls rows only) + classifier head ----
    @pl.when(layer == LAYERS - 1)
    def _():
        cls_rows = jnp.concatenate(
            [tok[b * SEQ:b * SEQ + 1, :] for b in range(BATCH)], axis=0)      # (B, H)
        yb = ln(cls_rows, lnf_g_ref[...], lnf_b_ref[...])
        logits_ref[...] = (
            jnp.dot(yb, w_head_ref[...], preferred_element_type=jnp.float32)
            + b_head_ref[...])


# ------------------------------- parameters ----------------------------------
def init_params(key):
    keys = iter(jax.random.split(key, 32))

    def nrm(shape, scale=0.02):
        return scale * jax.random.normal(next(keys), shape, dtype=jnp.float32)

    # TODO(synk): torch Linear weights are (out,in) and MultiheadAttention packs
    # in_proj_weight row-wise as (3D, D); loading real torchvision weights needs
    # a transpose into this column-packed x@W layout.
    return {
        # conv patch-embed weight stored pre-flattened as (C*P*P, HIDDEN)
        "conv_w": nrm((CPP, HIDDEN)),
        "conv_b": nrm((1, HIDDEN)),
        "cls": nrm((1, HIDDEN)),
        "pos": nrm((SEQ, HIDDEN)),
        # per-layer params stacked with a leading LAYERS dim
        "ln1_g": jnp.ones((LAYERS, 1, HIDDEN), jnp.float32),
        "ln1_b": jnp.zeros((LAYERS, 1, HIDDEN), jnp.float32),
        "w_qkv": nrm((LAYERS, HIDDEN, 3 * HIDDEN)),   # columns ordered [q | k | v]
        "b_qkv": nrm((LAYERS, 1, 3 * HIDDEN)),
        "w_o": nrm((LAYERS, HIDDEN, HIDDEN)),
        "b_o": nrm((LAYERS, 1, HIDDEN)),
        "ln2_g": jnp.ones((LAYERS, 1, HIDDEN), jnp.float32),
        "ln2_b": jnp.zeros((LAYERS, 1, HIDDEN), jnp.float32),
        "w_fc1": nrm((LAYERS, HIDDEN, MLP_DIM)),
        "b_fc1": nrm((LAYERS, 1, MLP_DIM)),
        "w_fc2": nrm((LAYERS, MLP_DIM, HIDDEN)),
        "b_fc2": nrm((LAYERS, 1, HIDDEN)),
        # final norm + head
        "ln_f_g": jnp.ones((1, HIDDEN), jnp.float32),
        "ln_f_b": jnp.zeros((1, HIDDEN), jnp.float32),
        "w_head": nrm((HIDDEN, CLASSES)),
        "b_head": jnp.zeros((1, CLASSES), jnp.float32),
    }


# -------------------------------- forward ------------------------------------
def vit_forward(x, p):
    B, C, H, W = x.shape
    assert (B, C, H, W) == (BATCH, IN_C, IMG, IMG)
    nh, nw = H // PATCH, W // PATCH

    # Host-side layout glue: exact per-patch flatten (matches Conv2d k=stride=PATCH),
    # with a zero row per batch where the cls token will sit so the kernel can do
    # one dense (B*SEQ, CPP) x (CPP, HIDDEN) matmul and one dense slab store.
    patches = x.reshape(B, C, nh, PATCH, nw, PATCH)
    patches = patches.transpose(0, 2, 4, 1, 3, 5).reshape(B, nh * nw, CPP)
    patch_slab = jnp.concatenate(
        [jnp.zeros((B, 1, CPP), jnp.float32), patches], axis=1).reshape(B * SEQ, CPP)

    # Additive embedding slab: row 0 per batch = cls + pos[0]; patch rows = conv_b + pos[1:].
    embed_bias = jnp.concatenate(
        [p["cls"] + p["pos"][0:1], p["pos"][1:] + p["conv_b"]], axis=0)       # (SEQ, HIDDEN)
    embed_bias = jnp.tile(embed_bias, (B, 1))                                 # (B*SEQ, HIDDEN)

    args = [
        patch_slab, p["conv_w"], embed_bias,
        p["ln1_g"], p["ln1_b"],
        p["w_qkv"], p["b_qkv"], p["w_o"], p["b_o"],
        p["ln2_g"], p["ln2_b"],
        p["w_fc1"], p["b_fc1"], p["w_fc2"], p["b_fc2"],
        p["ln_f_g"], p["ln_f_b"], p["w_head"], p["b_head"],
    ]

    in_specs = [
        pl.BlockSpec((B * SEQ, CPP), lambda l: (0, 0)),                       # patch_slab
        pl.BlockSpec((CPP, HIDDEN), lambda l: (0, 0)),                        # conv_w
        pl.BlockSpec((B * SEQ, HIDDEN), lambda l: (0, 0)),                    # embed_bias
        pl.BlockSpec((1, 1, HIDDEN), lambda l: (l, 0, 0)),                    # ln1_g
        pl.BlockSpec((1, 1, HIDDEN), lambda l: (l, 0, 0)),                    # ln1_b
        pl.BlockSpec((1, HIDDEN, 3 * HIDDEN), lambda l: (l, 0, 0)),           # w_qkv (packed)
        pl.BlockSpec((1, 1, 3 * HIDDEN), lambda l: (l, 0, 0)),                # b_qkv
        pl.BlockSpec((1, HIDDEN, HIDDEN), lambda l: (l, 0, 0)),               # w_o
        pl.BlockSpec((1, 1, HIDDEN), lambda l: (l, 0, 0)),                    # b_o
        pl.BlockSpec((1, 1, HIDDEN), lambda l: (l, 0, 0)),                    # ln2_g
        pl.BlockSpec((1, 1, HIDDEN), lambda l: (l, 0, 0)),                    # ln2_b
        pl.BlockSpec((1, HIDDEN, MLP_DIM), lambda l: (l, 0, 0)),              # w_fc1
        pl.BlockSpec((1, 1, MLP_DIM), lambda l: (l, 0, 0)),                   # b_fc1
        pl.BlockSpec((1, MLP_DIM, HIDDEN), lambda l: (l, 0, 0)),              # w_fc2
        pl.BlockSpec((1, 1, HIDDEN), lambda l: (l, 0, 0)),                    # b_fc2
        pl.BlockSpec((1, HIDDEN), lambda l: (0, 0)),                          # ln_f_g
        pl.BlockSpec((1, HIDDEN), lambda l: (0, 0)),                          # ln_f_b
        pl.BlockSpec((HIDDEN, CLASSES), lambda l: (0, 0)),                    # w_head
        pl.BlockSpec((1, CLASSES), lambda l: (0, 0)),                         # b_head
    ]

    # TODO(synk): torchvision ViT dropout layers are identity (p=0.0) and are omitted.
    return pl.pallas_call(
        _vit_kernel,
        out_shape=jax.ShapeDtypeStruct((B, CLASSES), jnp.float32),
        grid=(LAYERS,),
        in_specs=in_specs,
        out_specs=pl.BlockSpec((B, CLASSES), lambda l: (0, 0)),
        scratch_shapes=[
            pltpu.VMEM((BATCH * SEQ, HIDDEN), jnp.float32),   # token slab, resident across layers
        ],
        compiler_params=pltpu.CompilerParams(
            dimension_semantics=("arbitrary",),               # layers are sequentially dependent
            vmem_limit_bytes=32 * 1024 * 1024,
        ),
    )(*args)


# --------------------------------- driver -------------------------------------
if __name__ == "__main__":
    root = jax.random.PRNGKey(0)
    k_x, k_p = jax.random.split(root)
    x = jax.random.normal(k_x, (BATCH, IN_C, IMG, IMG), dtype=jnp.float32)
    params = init_params(k_p)
    logits = jax.jit(vit_forward)(x, params)
    jax.block_until_ready(logits)
    assert logits.shape == (BATCH, CLASSES)
    assert bool(jnp.all(jnp.isfinite(logits)))
    print("KERNEL_OK")
</pallas_src>

<mosaic_0001>
module attributes {stable_mosaic.version = 11 : i64} {
  func.func @_vit_kernel(%arg0: i32, %arg1: memref<10x192xf32, #tpu.memory_space<vmem>>, %arg2: memref<192x32xf32, #tpu.memory_space<vmem>>, %arg3: memref<10x32xf32, #tpu.memory_space<vmem>>, %arg4: memref<1x1x32xf32, #tpu.memory_space<vmem>>, %arg5: memref<1x1x32xf32, #tpu.memory_space<vmem>>, %arg6: memref<1x32x96xf32, #tpu.memory_space<vmem>>, %arg7: memref<1x1x96xf32, #tpu.memory_space<vmem>>, %arg8: memref<1x32x32xf32, #tpu.memory_space<vmem>>, %arg9: memref<1x1x32xf32, #tpu.memory_space<vmem>>, %arg10: memref<1x1x32xf32, #tpu.memory_space<vmem>>, %arg11: memref<1x1x32xf32, #tpu.memory_space<vmem>>, %arg12: memref<1x32x64xf32, #tpu.memory_space<vmem>>, %arg13: memref<1x1x64xf32, #tpu.memory_space<vmem>>, %arg14: memref<1x64x32xf32, #tpu.memory_space<vmem>>, %arg15: memref<1x1x32xf32, #tpu.memory_space<vmem>>, %arg16: memref<1x32xf32, #tpu.memory_space<vmem>>, %arg17: memref<1x32xf32, #tpu.memory_space<vmem>>, %arg18: memref<32x10xf32, #tpu.memory_space<vmem>>, %arg19: memref<1x10xf32, #tpu.memory_space<vmem>>, %arg20: memref<2x10xf32, #tpu.memory_space<vmem>>, %arg21: memref<10x32xf32, #tpu.memory_space<vmem>>) attributes {dimension_semantics = [#tpu.dimension_semantics<arbitrary>], iteration_bounds = array<i64: 2>, scalar_prefetch = 0 : i64, scratch_operands = 1 : i64, tpu.core_type = #tpu.core_type<tc>, window_params = [{pipeline_mode = #tpu.pipeline_mode<synchronous>, transform_indices = @transform_0, window_bounds = array<i64: 10, 192>}, {pipeline_mode = #tpu.pipeline_mode<synchronous>, transform_indices = @transform_1, window_bounds = array<i64: 192, 32>}, {pipeline_mode = #tpu.pipeline_mode<synchronous>, transform_indices = @transform_2, window_bounds = array<i64: 10, 32>}, {transform_indices = @transform_3, window_bounds = array<i64: 1, 1, 32>}, {transform_indices = @transform_4, window_bounds = array<i64: 1, 1, 32>}, {transform_indices = @transform_5, window_bounds = array<i64: 1, 32, 96>}, {transform_indices = @transform_6, window_bounds = array<i64: 1, 1, 96>}, {transform_indices = @transform_7, window_bounds = array<i64: 1, 32, 32>}, {transform_indices = @transform_8, window_bounds = array<i64: 1, 1, 32>}, {transform_indices = @transform_9, window_bounds = array<i64: 1, 1, 32>}, {transform_indices = @transform_10, window_bounds = array<i64: 1, 1, 32>}, {transform_indices = @transform_11, window_bounds = array<i64: 1, 32, 64>}, {transform_indices = @transform_12, window_bounds = array<i64: 1, 1, 64>}, {transform_indices = @transform_13, window_bounds = array<i64: 1, 64, 32>}, {transform_indices = @transform_14, window_bounds = array<i64: 1, 1, 32>}, {pipeline_mode = #tpu.pipeline_mode<synchronous>, transform_indices = @transform_15, window_bounds = array<i64: 1, 32>}, {pipeline_mode = #tpu.pipeline_mode<synchronous>, transform_indices = @transform_16, window_bounds = array<i64: 1, 32>}, {pipeline_mode = #tpu.pipeline_mode<synchronous>, transform_indices = @transform_17, window_bounds = array<i64: 32, 10>}, {pipeline_mode = #tpu.pipeline_mode<synchronous>, transform_indices = @transform_18, window_bounds = array<i64: 1, 10>}, {pipeline_mode = #tpu.pipeline_mode<synchronous>, transform_indices = @transform_19, window_bounds = array<i64: 2, 10>}]} {
    %c0_i32 = arith.constant 0 : i32
    %0 = arith.cmpi eq, %arg0, %c0_i32 : i32
    %1 = arith.extui %0 : i1 to i32
    %c0_i32_0 = arith.constant 0 : i32
    %2 = arith.cmpi ne, %1, %c0_i32_0 : i32
    scf.if %2 {
      %c0_97 = arith.constant 0 : index
      %c0_98 = arith.constant 0 : index
      %239 = vector.load %arg1[%c0_97, %c0_98] : memref<10x192xf32, #tpu.memory_space<vmem>>, vector<10x192xf32>
      %c0_99 = arith.constant 0 : index
      %c0_100 = arith.constant 0 : index
      %240 = vector.load %arg2[%c0_99, %c0_100] : memref<192x32xf32, #tpu.memory_space<vmem>>, vector<192x32xf32>
      %cst_101 = arith.constant dense<0.000000e+00> : vector<10x32xf32>
      %241 = tpu.matmul %239, %240, %cst_101 {dimension_numbers = #tpu.dot_dimension_numbers<[1], [0], [0], [1], [0, 0, 1, 1], [], []>} : vector<10x192xf32>, vector<192x32xf32>, vector<10x32xf32> -> vector<10x32xf32>
      %c0_102 = arith.constant 0 : index
      %c0_103 = arith.constant 0 : index
      %242 = vector.load %arg3[%c0_102, %c0_103] : memref<10x32xf32, #tpu.memory_space<vmem>>, vector<10x32xf32>
      %243 = arith.addf %241, %242 : vector<10x32xf32>
      %c0_104 = arith.constant 0 : index
      %c0_105 = arith.constant 0 : index
      %244 = vector.load %arg21[%c0_104, %c0_105] : memref<10x32xf32, #tpu.memory_space<vmem>>, vector<10x32xf32>
      tpu.vector_store %arg21[%c0_104, %c0_105], %243 {strides = array<i32>} : memref<10x32xf32, #tpu.memory_space<vmem>>, vector<10x32xf32>,
    } else {
    }
    %c0 = arith.constant 0 : index
    %c0_1 = arith.constant 0 : index
    %3 = vector.load %arg21[%c0, %c0_1] : memref<10x32xf32, #tpu.memory_space<vmem>>, vector<10x32xf32>
    %c0_2 = arith.constant 0 : index
    %c0_3 = arith.constant 0 : index
    %c0_4 = arith.constant 0 : index
    %4 = vector.load %arg4[%c0_2, %c0_3, %c0_4] : memref<1x1x32xf32, #tpu.memory_space<vmem>>, vector<1x1x32xf32>
    %5 = vector.shape_cast %4 : vector<1x1x32xf32> to vector<1x32xf32>
    %c0_5 = arith.constant 0 : index
    %c0_6 = arith.constant 0 : index
    %c0_7 = arith.constant 0 : index
    %6 = vector.load %arg5[%c0_5, %c0_6, %c0_7] : memref<1x1x32xf32, #tpu.memory_space<vmem>>, vector<1x1x32xf32>
    %7 = vector.shape_cast %6 : vector<1x1x32xf32> to vector<1x32xf32>
    %cst = arith.constant dense<0.000000e+00> : vector<10xf32>
    %8 = vector.multi_reduction <add>, %3, %cst [1] : vector<10x32xf32> to vector<10xf32>
    %9 = vector.shape_cast %8 : vector<10xf32> to vector<10x1xf32>
    %cst_8 = arith.constant 3.200000e+01 : f32
    %10 = vector.broadcast %cst_8 : f32 to vector<10x1xf32>
    %11 = arith.divf %9, %10 : vector<10x1xf32>
    %12 = vector.broadcast %11 : vector<10x1xf32> to vector<10x32xf32>
    %13 = arith.subf %3, %12 : vector<10x32xf32>
    %14 = arith.mulf %13, %13 : vector<10x32xf32>
    %cst_9 = arith.constant dense<0.000000e+00> : vector<10xf32>
    %15 = vector.multi_reduction <add>, %14, %cst_9 [1] : vector<10x32xf32> to vector<10xf32>
    %16 = vector.shape_cast %15 : vector<10xf32> to vector<10x1xf32>
    %cst_10 = arith.constant 3.200000e+01 : f32
    %17 = vector.broadcast %cst_10 : f32 to vector<10x1xf32>
    %18 = arith.divf %16, %17 : vector<10x1xf32>
    %cst_11 = arith.constant 9.99999997E-7 : f32
    %19 = vector.broadcast %cst_11 : f32 to vector<10x1xf32>
    %20 = arith.addf %18, %19 : vector<10x1xf32>
    %21 = math.rsqrt %20 : vector<10x1xf32>
    %22 = vector.broadcast %21 : vector<10x1xf32> to vector<10x32xf32>
    %23 = arith.mulf %13, %22 : vector<10x32xf32>
    %24 = vector.broadcast %5 : vector<1x32xf32> to vector<10x32xf32>
    %25 = arith.mulf %23, %24 : vector<10x32xf32>
    %26 = vector.broadcast %7 : vector<1x32xf32> to vector<10x32xf32>
    %27 = arith.addf %25, %26 : vector<10x32xf32>
    %c0_12 = arith.constant 0 : index
    %c0_13 = arith.constant 0 : index
    %c0_14 = arith.constant 0 : index
    %28 = vector.load %arg6[%c0_12, %c0_13, %c0_14] : memref<1x32x96xf32, #tpu.memory_space<vmem>>, vector<1x32x96xf32>
    %29 = vector.shape_cast %28 : vector<1x32x96xf32> to vector<32x96xf32>
    %cst_15 = arith.constant dense<0.000000e+00> : vector<10x96xf32>
    %30 = tpu.matmul %27, %29, %cst_15 {dimension_numbers = #tpu.dot_dimension_numbers<[1], [0], [0], [1], [0, 0, 1, 1], [], []>} : vector<10x32xf32>, vector<32x96xf32>, vector<10x96xf32> -> vector<10x96xf32>
    %c0_16 = arith.constant 0 : index
    %c0_17 = arith.constant 0 : index
    %c0_18 = arith.constant 0 : index
    %31 = vector.load %arg7[%c0_16, %c0_17, %c0_18] : memref<1x1x96xf32, #tpu.memory_space<vmem>>, vector<1x1x96xf32>
    %32 = vector.shape_cast %31 : vector<1x1x96xf32> to vector<1x96xf32>
    %33 = vector.broadcast %32 : vector<1x96xf32> to vector<10x96xf32>
    %34 = arith.addf %30, %33 : vector<10x96xf32>
    %35 = vector.extract_strided_slice %34 {offsets = [0, 0], sizes = [5, 32], strides = [1, 1]} : vector<10x96xf32> to vector<5x32xf32>
    %36 = vector.extract_strided_slice %34 {offsets = [0, 32], sizes = [5, 32], strides = [1, 1]} : vector<10x96xf32> to vector<5x32xf32>
    %37 = vector.extract_strided_slice %34 {offsets = [0, 64], sizes = [5, 32], strides = [1, 1]} : vector<10x96xf32> to vector<5x32xf32>
    %38 = vector.extract_strided_slice %35 {offsets = [0, 0], sizes = [5, 8], strides = [1, 1]} : vector<5x32xf32> to vector<5x8xf32>
    %39 = vector.extract_strided_slice %36 {offsets = [0, 0], sizes = [5, 8], strides = [1, 1]} : vector<5x32xf32> to vector<5x8xf32>
    %40 = vector.extract_strided_slice %37 {offsets = [0, 0], sizes = [5, 8], strides = [1, 1]} : vector<5x32xf32> to vector<5x8xf32>
    %cst_19 = arith.constant dense<0.000000e+00> : vector<5x5xf32>
    %41 = tpu.matmul %38, %39, %cst_19 {dimension_numbers = #tpu.dot_dimension_numbers<[1], [1], [0], [0], [0, 0, 1, 0], [], []>} : vector<5x8xf32>, vector<5x8xf32>, vector<5x5xf32> -> vector<5x5xf32>
    %cst_20 = arith.constant 0.353553385 : f32
    %42 = vector.broadcast %cst_20 : f32 to vector<5x5xf32>
    %43 = arith.mulf %41, %42 : vector<5x5xf32>
    %cst_21 = arith.constant dense<0xFF800000> : vector<5xf32>
    %44 = vector.multi_reduction <maximumf>, %43, %cst_21 [1] : vector<5x5xf32> to vector<5xf32>
    %45 = vector.shape_cast %44 : vector<5xf32> to vector<5x1xf32>
    %46 = vector.broadcast %45 : vector<5x1xf32> to vector<5x5xf32>
    %47 = arith.subf %43, %46 : vector<5x5xf32>
    %48 = math.exp %47 : vector<5x5xf32>
    %cst_22 = arith.constant dense<0.000000e+00> : vector<5xf32>
    %49 = vector.multi_reduction <add>, %48, %cst_22 [1] : vector<5x5xf32> to vector<5xf32>
    %50 = vector.shape_cast %49 : vector<5xf32> to vector<5x1xf32>
    %51 = tpu.reciprocal %50 {approx = true} : vector<5x1xf32> -> vector<5x1xf32>
    %52 = vector.broadcast %51 : vector<5x1xf32> to vector<5x5xf32>
    %53 = arith.mulf %48, %52 : vector<5x5xf32>
    %cst_23 = arith.constant dense<0.000000e+00> : vector<5x8xf32>
    %54 = tpu.matmul %53, %40, %cst_23 {dimension_numbers = #tpu.dot_dimension_numbers<[1], [0], [0], [1], [0, 0, 1, 1], [], []>} : vector<5x5xf32>, vector<5x8xf32>, vector<5x8xf32> -> vector<5x8xf32>
    %55 = vector.extract_strided_slice %35 {offsets = [0, 8], sizes = [5, 8], strides = [1, 1]} : vector<5x32xf32> to vector<5x8xf32>
    %56 = vector.extract_strided_slice %36 {offsets = [0, 8], sizes = [5, 8], strides = [1, 1]} : vector<5x32xf32> to vector<5x8xf32>
    %57 = vector.extract_strided_slice %37 {offsets = [0, 8], sizes = [5, 8], strides = [1, 1]} : vector<5x32xf32> to vector<5x8xf32>
    %cst_24 = arith.constant dense<0.000000e+00> : vector<5x5xf32>
    %58 = tpu.matmul %55, %56, %cst_24 {dimension_numbers = #tpu.dot_dimension_numbers<[1], [1], [0], [0], [0, 0, 1, 0], [], []>} : vector<5x8xf32>, vector<5x8xf32>, vector<5x5xf32> -> vector<5x5xf32>
    %cst_25 = arith.constant 0.353553385 : f32
    %59 = vector.broadcast %cst_25 : f32 to vector<5x5xf32>
    %60 = arith.mulf %58, %59 : vector<5x5xf32>
    %cst_26 = arith.constant dense<0xFF800000> : vector<5xf32>
    %61 = vector.multi_reduction <maximumf>, %60, %cst_26 [1] : vector<5x5xf32> to vector<5xf32>
    %62 = vector.shape_cast %61 : vector<5xf32> to vector<5x1xf32>
    %63 = vector.broadcast %62 : vector<5x1xf32> to vector<5x5xf32>
    %64 = arith.subf %60, %63 : vector<5x5xf32>
    %65 = math.exp %64 : vector<5x5xf32>
    %cst_27 = arith.constant dense<0.000000e+00> : vector<5xf32>
    %66 = vector.multi_reduction <add>, %65, %cst_27 [1] : vector<5x5xf32> to vector<5xf32>
    %67 = vector.shape_cast %66 : vector<5xf32> to vector<5x1xf32>
    %68 = tpu.reciprocal %67 {approx = true} : vector<5x1xf32> -> vector<5x1xf32>
    %69 = vector.broadcast %68 : vector<5x1xf32> to vector<5x5xf32>
    %70 = arith.mulf %65, %69 : vector<5x5xf32>
    %cst_28 = arith.constant dense<0.000000e+00> : vector<5x8xf32>
    %71 = tpu.matmul %70, %57, %cst_28 {dimension_numbers = #tpu.dot_dimension_numbers<[1], [0], [0], [1], [0, 0, 1, 1], [], []>} : vector<5x5xf32>, vector<5x8xf32>, vector<5x8xf32> -> vector<5x8xf32>
    %72 = vector.extract_strided_slice %35 {offsets = [0, 16], sizes = [5, 8], strides = [1, 1]} : vector<5x32xf32> to vector<5x8xf32>
    %73 = vector.extract_strided_slice %36 {offsets = [0, 16], sizes = [5, 8], strides = [1, 1]} : vector<5x32xf32> to vector<5x8xf32>
    %74 = vector.extract_strided_slice %37 {offsets = [0, 16], sizes = [5, 8], strides = [1, 1]} : vector<5x32xf32> to vector<5x8xf32>
    %cst_29 = arith.constant dense<0.000000e+00> : vector<5x5xf32>
    %75 = tpu.matmul %72, %73, %cst_29 {dimension_numbers = #tpu.dot_dimension_numbers<[1], [1], [0], [0], [0, 0, 1, 0], [], []>} : vector<5x8xf32>, vector<5x8xf32>, vector<5x5xf32> -> vector<5x5xf32>
    %cst_30 = arith.constant 0.353553385 : f32
    %76 = vector.broadcast %cst_30 : f32 to vector<5x5xf32>
    %77 = arith.mulf %75, %76 : vector<5x5xf32>
    %cst_31 = arith.constant dense<0xFF800000> : vector<5xf32>
    %78 = vector.multi_reduction <maximumf>, %77, %cst_31 [1] : vector<5x5xf32> to vector<5xf32>
    %79 = vector.shape_cast %78 : vector<5xf32> to vector<5x1xf32>
    %80 = vector.broadcast %79 : vector<5x1xf32> to vector<5x5xf32>
    %81 = arith.subf %77, %80 : vector<5x5xf32>
    %82 = math.exp %81 : vector<5x5xf32>
    %cst_32 = arith.constant dense<0.000000e+00> : vector<5xf32>
    %83 = vector.multi_reduction <add>, %82, %cst_32 [1] : vector<5x5xf32> to vector<5xf32>
    %84 = vector.shape_cast %83 : vector<5xf32> to vector<5x1xf32>
    %85 = tpu.reciprocal %84 {approx = true} : vector<5x1xf32> -> vector<5x1xf32>
    %86 = vector.broadcast %85 : vector<5x1xf32> to vector<5x5xf32>
    %87 = arith.mulf %82, %86 : vector<5x5xf32>
    %cst_33 = arith.constant dense<0.000000e+00> : vector<5x8xf32>
    %88 = tpu.matmul %87, %74, %cst_33 {dimension_numbers = #tpu.dot_dimension_numbers<[1], [0], [0], [1], [0, 0, 1, 1], [], []>} : vector<5x5xf32>, vector<5x8xf32>, vector<5x8xf32> -> vector<5x8xf32>
    %89 = vector.extract_strided_slice %35 {offsets = [0, 24], sizes = [5, 8], strides = [1, 1]} : vector<5x32xf32> to vector<5x8xf32>
    %90 = vector.extract_strided_slice %36 {offsets = [0, 24], sizes = [5, 8], strides = [1, 1]} : vector<5x32xf32> to vector<5x8xf32>
    %91 = vector.extract_strided_slice %37 {offsets = [0, 24], sizes = [5, 8], strides = [1, 1]} : vector<5x32xf32> to vector<5x8xf32>
    %cst_34 = arith.constant dense<0.000000e+00> : vector<5x5xf32>
    %92 = tpu.matmul %89, %90, %cst_34 {dimension_numbers = #tpu.dot_dimension_numbers<[1], [1], [0], [0], [0, 0, 1, 0], [], []>} : vector<5x8xf32>, vector<5x8xf32>, vector<5x5xf32> -> vector<5x5xf32>
    %cst_35 = arith.constant 0.353553385 : f32
    %93 = vector.broadcast %cst_35 : f32 to vector<5x5xf32>
    %94 = arith.mulf %92, %93 : vector<5x5xf32>
    %cst_36 = arith.constant dense<0xFF800000> : vector<5xf32>
    %95 = vector.multi_reduction <maximumf>, %94, %cst_36 [1] : vector<5x5xf32> to vector<5xf32>
    %96 = vector.shape_cast %95 : vector<5xf32> to vector<5x1xf32>
    %97 = vector.broadcast %96 : vector<5x1xf32> to vector<5x5xf32>
    %98 = arith.subf %94, %97 : vector<5x5xf32>
    %99 = math.exp %98 : vector<5x5xf32>
    %cst_37 = arith.constant dense<0.000000e+00> : vector<5xf32>
    %100 = vector.multi_reduction <add>, %99, %cst_37 [1] : vector<5x5xf32> to vector<5xf32>
    %101 = vector.shape_cast %100 : vector<5xf32> to vector<5x1xf32>
    %102 = tpu.reciprocal %101 {approx = true} : vector<5x1xf32> -> vector<5x1xf32>
    %103 = vector.broadcast %102 : vector<5x1xf32> to vector<5x5xf32>
    %104 = arith.mulf %99, %103 : vector<5x5xf32>
    %cst_38 = arith.constant dense<0.000000e+00> : vector<5x8xf32>
    %105 = tpu.matmul %104, %91, %cst_38 {dimension_numbers = #tpu.dot_dimension_numbers<[1], [0], [0], [1], [0, 0, 1, 1], [], []>} : vector<5x5xf32>, vector<5x8xf32>, vector<5x8xf32> -> vector<5x8xf32>
    %106 = tpu.concatenate %54, %71, %88, %105 in 1 : vector<5x8xf32>, vector<5x8xf32>, vector<5x8xf32>, vector<5x8xf32> -> vector<5x32xf32>
    %107 = vector.extract_strided_slice %34 {offsets = [5, 0], sizes = [5, 32], strides = [1, 1]} : vector<10x96xf32> to vector<5x32xf32>
    %108 = vector.extract_strided_slice %34 {offsets = [5, 32], sizes = [5, 32], strides = [1, 1]} : vector<10x96xf32> to vector<5x32xf32>
    %109 = vector.extract_strided_slice %34 {offsets = [5, 64], sizes = [5, 32], strides = [1, 1]} : vector<10x96xf32> to vector<5x32xf32>
    %110 = vector.extract_strided_slice %107 {offsets = [0, 0], sizes = [5, 8], strides = [1, 1]} : vector<5x32xf32> to vector<5x8xf32>
    %111 = vector.extract_strided_slice %108 {offsets = [0, 0], sizes = [5, 8], strides = [1, 1]} : vector<5x32xf32> to vector<5x8xf32>
    %112 = vector.extract_strided_slice %109 {offsets = [0, 0], sizes = [5, 8], strides = [1, 1]} : vector<5x32xf32> to vector<5x8xf32>
    %cst_39 = arith.constant dense<0.000000e+00> : vector<5x5xf32>
    %113 = tpu.matmul %110, %111, %cst_39 {dimension_numbers = #tpu.dot_dimension_numbers<[1], [1], [0], [0], [0, 0, 1, 0], [], []>} : vector<5x8xf32>, vector<5x8xf32>, vector<5x5xf32> -> vector<5x5xf32>
    %cst_40 = arith.constant 0.353553385 : f32
    %114 = vector.broadcast %cst_40 : f32 to vector<5x5xf32>
    %115 = arith.mulf %113, %114 : vector<5x5xf32>
    %cst_41 = arith.constant dense<0xFF800000> : vector<5xf32>
    %116 = vector.multi_reduction <maximumf>, %115, %cst_41 [1] : vector<5x5xf32> to vector<5xf32>
    %117 = vector.shape_cast %116 : vector<5xf32> to vector<5x1xf32>
    %118 = vector.broadcast %117 : vector<5x1xf32> to vector<5x5xf32>
    %119 = arith.subf %115, %118 : vector<5x5xf32>
    %120 = math.exp %119 : vector<5x5xf32>
    %cst_42 = arith.constant dense<0.000000e+00> : vector<5xf32>
    %121 = vector.multi_reduction <add>, %120, %cst_42 [1] : vector<5x5xf32> to vector<5xf32>
    %122 = vector.shape_cast %121 : vector<5xf32> to vector<5x1xf32>
    %123 = tpu.reciprocal %122 {approx = true} : vector<5x1xf32> -> vector<5x1xf32>
    %124 = vector.broadcast %123 : vector<5x1xf32> to vector<5x5xf32>
    %125 = arith.mulf %120, %124 : vector<5x5xf32>
    %cst_43 = arith.constant dense<0.000000e+00> : vector<5x8xf32>
    %126 = tpu.matmul %125, %112, %cst_43 {dimension_numbers = #tpu.dot_dimension_numbers<[1], [0], [0], [1], [0, 0, 1, 1], [], []>} : vector<5x5xf32>, vector<5x8xf32>, vector<5x8xf32> -> vector<5x8xf32>
    %127 = vector.extract_strided_slice %107 {offsets = [0, 8], sizes = [5, 8], strides = [1, 1]} : vector<5x32xf32> to vector<5x8xf32>
    %128 = vector.extract_strided_slice %108 {offsets = [0, 8], sizes = [5, 8], strides = [1, 1]} : vector<5x32xf32> to vector<5x8xf32>
    %129 = vector.extract_strided_slice %109 {offsets = [0, 8], sizes = [5, 8], strides = [1, 1]} : vector<5x32xf32> to vector<5x8xf32>
    %cst_44 = arith.constant dense<0.000000e+00> : vector<5x5xf32>
    %130 = tpu.matmul %127, %128, %cst_44 {dimension_numbers = #tpu.dot_dimension_numbers<[1], [1], [0], [0], [0, 0, 1, 0], [], []>} : vector<5x8xf32>, vector<5x8xf32>, vector<5x5xf32> -> vector<5x5xf32>
    %cst_45 = arith.constant 0.353553385 : f32
    %131 = vector.broadcast %cst_45 : f32 to vector<5x5xf32>
    %132 = arith.mulf %130, %131 : vector<5x5xf32>
    %cst_46 = arith.constant dense<0xFF800000> : vector<5xf32>
    %133 = vector.multi_reduction <maximumf>, %132, %cst_46 [1] : vector<5x5xf32> to vector<5xf32>
    %134 = vector.shape_cast %133 : vector<5xf32> to vector<5x1xf32>
    %135 = vector.broadcast %134 : vector<5x1xf32> to vector<5x5xf32>
    %136 = arith.subf %132, %135 : vector<5x5xf32>
    %137 = math.exp %136 : vector<5x5xf32>
    %cst_47 = arith.constant dense<0.000000e+00> : vector<5xf32>
    %138 = vector.multi_reduction <add>, %137, %cst_47 [1] : vector<5x5xf32> to vector<5xf32>
    %139 = vector.shape_cast %138 : vector<5xf32> to vector<5x1xf32>
    %140 = tpu.reciprocal %139 {approx = true} : vector<5x1xf32> -> vector<5x1xf32>
    %141 = vector.broadcast %140 : vector<5x1xf32> to vector<5x5xf32>
    %142 = arith.mulf %137, %141 : vector<5x5xf32>
    %cst_48 = arith.constant dense<0.000000e+00> : vector<5x8xf32>
    %143 = tpu.matmul %142, %129, %cst_48 {dimension_numbers = #tpu.dot_dimension_numbers<[1], [0], [0], [1], [0, 0, 1, 1], [], []>} : vector<5x5xf32>, vector<5x8xf32>, vector<5x8xf32> -> vector<5x8xf32>
    %144 = vector.extract_strided_slice %107 {offsets = [0, 16], sizes = [5, 8], strides = [1, 1]} : vector<5x32xf32> to vector<5x8xf32>
    %145 = vector.extract_strided_slice %108 {offsets = [0, 16], sizes = [5, 8], strides = [1, 1]} : vector<5x32xf32> to vector<5x8xf32>
    %146 = vector.extract_strided_slice %109 {offsets = [0, 16], sizes = [5, 8], strides = [1, 1]} : vector<5x32xf32> to vector<5x8xf32>
    %cst_49 = arith.constant dense<0.000000e+00> : vector<5x5xf32>
    %147 = tpu.matmul %144, %145, %cst_49 {dimension_numbers = #tpu.dot_dimension_numbers<[1], [1], [0], [0], [0, 0, 1, 0], [], []>} : vector<5x8xf32>, vector<5x8xf32>, vector<5x5xf32> -> vector<5x5xf32>
    %cst_50 = arith.constant 0.353553385 : f32
    %148 = vector.broadcast %cst_50 : f32 to vector<5x5xf32>
    %149 = arith.mulf %147, %148 : vector<5x5xf32>
    %cst_51 = arith.constant dense<0xFF800000> : vector<5xf32>
    %150 = vector.multi_reduction <maximumf>, %149, %cst_51 [1] : vector<5x5xf32> to vector<5xf32>
    %151 = vector.shape_cast %150 : vector<5xf32> to vector<5x1xf32>
    %152 = vector.broadcast %151 : vector<5x1xf32> to vector<5x5xf32>
    %153 = arith.subf %149, %152 : vector<5x5xf32>
    %154 = math.exp %153 : vector<5x5xf32>
    %cst_52 = arith.constant dense<0.000000e+00> : vector<5xf32>
    %155 = vector.multi_reduction <add>, %154, %cst_52 [1] : vector<5x5xf32> to vector<5xf32>
    %156 = vector.shape_cast %155 : vector<5xf32> to vector<5x1xf32>
    %157 = tpu.reciprocal %156 {approx = true} : vector<5x1xf32> -> vector<5x1xf32>
    %158 = vector.broadcast %157 : vector<5x1xf32> to vector<5x5xf32>
    %159 = arith.mulf %154, %158 : vector<5x5xf32>
    %cst_53 = arith.constant dense<0.000000e+00> : vector<5x8xf32>
    %160 = tpu.matmul %159, %146, %cst_53 {dimension_numbers = #tpu.dot_dimension_numbers<[1], [0], [0], [1], [0, 0, 1, 1], [], []>} : vector<5x5xf32>, vector<5x8xf32>, vector<5x8xf32> -> vector<5x8xf32>
    %161 = vector.extract_strided_slice %107 {offsets = [0, 24], sizes = [5, 8], strides = [1, 1]} : vector<5x32xf32> to vector<5x8xf32>
    %162 = vector.extract_strided_slice %108 {offsets = [0, 24], sizes = [5, 8], strides = [1, 1]} : vector<5x32xf32> to vector<5x8xf32>
    %163 = vector.extract_strided_slice %109 {offsets = [0, 24], sizes = [5, 8], strides = [1, 1]} : vector<5x32xf32> to vector<5x8xf32>
    %cst_54 = arith.constant dense<0.000000e+00> : vector<5x5xf32>
    %164 = tpu.matmul %161, %162, %cst_54 {dimension_numbers = #tpu.dot_dimension_numbers<[1], [1], [0], [0], [0, 0, 1, 0], [], []>} : vector<5x8xf32>, vector<5x8xf32>, vector<5x5xf32> -> vector<5x5xf32>
    %cst_55 = arith.constant 0.353553385 : f32
    %165 = vector.broadcast %cst_55 : f32 to vector<5x5xf32>
    %166 = arith.mulf %164, %165 : vector<5x5xf32>
    %cst_56 = arith.constant dense<0xFF800000> : vector<5xf32>
    %167 = vector.multi_reduction <maximumf>, %166, %cst_56 [1] : vector<5x5xf32> to vector<5xf32>
    %168 = vector.shape_cast %167 : vector<5xf32> to vector<5x1xf32>
    %169 = vector.broadcast %168 : vector<5x1xf32> to vector<5x5xf32>
    %170 = arith.subf %166, %169 : vector<5x5xf32>
    %171 = math.exp %170 : vector<5x5xf32>
    %cst_57 = arith.constant dense<0.000000e+00> : vector<5xf32>
    %172 = vector.multi_reduction <add>, %171, %cst_57 [1] : vector<5x5xf32> to vector<5xf32>
    %173 = vector.shape_cast %172 : vector<5xf32> to vector<5x1xf32>
    %174 = tpu.reciprocal %173 {approx = true} : vector<5x1xf32> -> vector<5x1xf32>
    %175 = vector.broadcast %174 : vector<5x1xf32> to vector<5x5xf32>
    %176 = arith.mulf %171, %175 : vector<5x5xf32>
    %cst_58 = arith.constant dense<0.000000e+00> : vector<5x8xf32>
    %177 = tpu.matmul %176, %163, %cst_58 {dimension_numbers = #tpu.dot_dimension_numbers<[1], [0], [0], [1], [0, 0, 1, 1], [], []>} : vector<5x5xf32>, vector<5x8xf32>, vector<5x8xf32> -> vector<5x8xf32>
    %178 = tpu.concatenate %126, %143, %160, %177 in 1 : vector<5x8xf32>, vector<5x8xf32>, vector<5x8xf32>, vector<5x8xf32> -> vector<5x32xf32>
    %179 = tpu.concatenate %106, %178 in 0 : vector<5x32xf32>, vector<5x32xf32> -> vector<10x32xf32>
    %c0_59 = arith.constant 0 : index
    %c0_60 = arith.constant 0 : index
    %c0_61 = arith.constant 0 : index
    %180 = vector.load %arg8[%c0_59, %c0_60, %c0_61] : memref<1x32x32xf32, #tpu.memory_space<vmem>>, vector<1x32x32xf32>
    %181 = vector.shape_cast %180 : vector<1x32x32xf32> to vector<32x32xf32>
    %cst_62 = arith.constant dense<0.000000e+00> : vector<10x32xf32>
    %182 = tpu.matmul %179, %181, %cst_62 {dimension_numbers = #tpu.dot_dimension_numbers<[1], [0], [0], [1], [0, 0, 1, 1], [], []>} : vector<10x32xf32>, vector<32x32xf32>, vector<10x32xf32> -> vector<10x32xf32>
    %c0_63 = arith.constant 0 : index
    %c0_64 = arith.constant 0 : index
    %c0_65 = arith.constant 0 : index
    %183 = vector.load %arg9[%c0_63, %c0_64, %c0_65] : memref<1x1x32xf32, #tpu.memory_space<vmem>>, vector<1x1x32xf32>
    %184 = vector.shape_cast %183 : vector<1x1x32xf32> to vector<1x32xf32>
    %185 = vector.broadcast %184 : vector<1x32xf32> to vector<10x32xf32>
    %186 = arith.addf %182, %185 : vector<10x32xf32>
    %187 = arith.addf %3, %186 : vector<10x32xf32>
    %c0_66 = arith.constant 0 : index
    %c0_67 = arith.constant 0 : index
    %c0_68 = arith.constant 0 : index
    %188 = vector.load %arg10[%c0_66, %c0_67, %c0_68] : memref<1x1x32xf32, #tpu.memory_space<vmem>>, vector<1x1x32xf32>
    %189 = vector.shape_cast %188 : vector<1x1x32xf32> to vector<1x32xf32>
    %c0_69 = arith.constant 0 : index
    %c0_70 = arith.constant 0 : index
    %c0_71 = arith.constant 0 : index
    %190 = vector.load %arg11[%c0_69, %c0_70, %c0_71] : memref<1x1x32xf32, #tpu.memory_space<vmem>>, vector<1x1x32xf32>
    %191 = vector.shape_cast %190 : vector<1x1x32xf32> to vector<1x32xf32>
    %cst_72 = arith.constant dense<0.000000e+00> : vector<10xf32>
    %192 = vector.multi_reduction <add>, %187, %cst_72 [1] : vector<10x32xf32> to vector<10xf32>
    %193 = vector.shape_cast %192 : vector<10xf32> to vector<10x1xf32>
    %cst_73 = arith.constant 3.200000e+01 : f32
    %194 = vector.broadcast %cst_73 : f32 to vector<10x1xf32>
    %195 = arith.divf %193, %194 : vector<10x1xf32>
    %196 = vector.broadcast %195 : vector<10x1xf32> to vector<10x32xf32>
    %197 = arith.subf %187, %196 : vector<10x32xf32>
    %198 = arith.mulf %197, %197 : vector<10x32xf32>
    %cst_74 = arith.constant dense<0.000000e+00> : vector<10xf32>
    %199 = vector.multi_reduction <add>, %198, %cst_74 [1] : vector<10x32xf32> to vector<10xf32>
    %200 = vector.shape_cast %199 : vector<10xf32> to vector<10x1xf32>
    %cst_75 = arith.constant 3.200000e+01 : f32
    %201 = vector.broadcast %cst_75 : f32 to vector<10x1xf32>
    %202 = arith.divf %200, %201 : vector<10x1xf32>
    %cst_76 = arith.constant 9.99999997E-7 : f32
    %203 = vector.broadcast %cst_76 : f32 to vector<10x1xf32>
    %204 = arith.addf %202, %203 : vector<10x1xf32>
    %205 = math.rsqrt %204 : vector<10x1xf32>
    %206 = vector.broadcast %205 : vector<10x1xf32> to vector<10x32xf32>
    %207 = arith.mulf %197, %206 : vector<10x32xf32>
    %208 = vector.broadcast %189 : vector<1x32xf32> to vector<10x32xf32>
    %209 = arith.mulf %207, %208 : vector<10x32xf32>
    %210 = vector.broadcast %191 : vector<1x32xf32> to vector<10x32xf32>
    %211 = arith.addf %209, %210 : vector<10x32xf32>
    %c0_77 = arith.constant 0 : index
    %c0_78 = arith.constant 0 : index
    %c0_79 = arith.constant 0 : index
    %212 = vector.load %arg12[%c0_77, %c0_78, %c0_79] : memref<1x32x64xf32, #tpu.memory_space<vmem>>, vector<1x32x64xf32>
    %213 = vector.shape_cast %212 : vector<1x32x64xf32> to vector<32x64xf32>
    %cst_80 = arith.constant dense<0.000000e+00> : vector<10x64xf32>
    %214 = tpu.matmul %211, %213, %cst_80 {dimension_numbers = #tpu.dot_dimension_numbers<[1], [0], [0], [1], [0, 0, 1, 1], [], []>} : vector<10x32xf32>, vector<32x64xf32>, vector<10x64xf32> -> vector<10x64xf32>
    %c0_81 = arith.constant 0 : index
    %c0_82 = arith.constant 0 : index
    %c0_83 = arith.constant 0 : index
    %215 = vector.load %arg13[%c0_81, %c0_82, %c0_83] : memref<1x1x64xf32, #tpu.memory_space<vmem>>, vector<1x1x64xf32>
    %216 = vector.shape_cast %215 : vector<1x1x64xf32> to vector<1x64xf32>
    %217 = vector.broadcast %216 : vector<1x64xf32> to vector<10x64xf32>
    %218 = arith.addf %214, %217 : vector<10x64xf32>
    %cst_84 = arith.constant 5.000000e-01 : f32
    %219 = vector.broadcast %cst_84 : f32 to vector<10x64xf32>
    %220 = arith.mulf %219, %218 : vector<10x64xf32>
    %cst_85 = arith.constant 0.707106769 : f32
    %221 = vector.broadcast %cst_85 : f32 to vector<10x64xf32>
    %222 = arith.mulf %218, %221 : vector<10x64xf32>
    %223 = math.erf %222 : vector<10x64xf32>
    %cst_86 = arith.constant 1.000000e+00 : f32
    %224 = vector.broadcast %cst_86 : f32 to vector<10x64xf32>
    %225 = arith.addf %224, %223 : vector<10x64xf32>
    %226 = arith.mulf %220, %225 : vector<10x64xf32>
    %c0_87 = arith.constant 0 : index
    %c0_88 = arith.constant 0 : index
    %c0_89 = arith.constant 0 : index
    %227 = vector.load %arg14[%c0_87, %c0_88, %c0_89] : memref<1x64x32xf32, #tpu.memory_space<vmem>>, vector<1x64x32xf32>
    %228 = vector.shape_cast %227 : vector<1x64x32xf32> to vector<64x32xf32>
    %cst_90 = arith.constant dense<0.000000e+00> : vector<10x32xf32>
    %229 = tpu.matmul %226, %228, %cst_90 {dimension_numbers = #tpu.dot_dimension_numbers<[1], [0], [0], [1], [0, 0, 1, 1], [], []>} : vector<10x64xf32>, vector<64x32xf32>, vector<10x32xf32> -> vector<10x32xf32>
    %c0_91 = arith.constant 0 : index
    %c0_92 = arith.constant 0 : index
    %c0_93 = arith.constant 0 : index
    %230 = vector.load %arg15[%c0_91, %c0_92, %c0_93] : memref<1x1x32xf32, #tpu.memory_space<vmem>>, vector<1x1x32xf32>
    %231 = vector.shape_cast %230 : vector<1x1x32xf32> to vector<1x32xf32>
    %232 = vector.broadcast %231 : vector<1x32xf32> to vector<10x32xf32>
    %233 = arith.addf %229, %232 : vector<10x32xf32>
    %234 = arith.addf %187, %233 : vector<10x32xf32>
    %c0_94 = arith.constant 0 : index
    %c0_95 = arith.constant 0 : index
    %235 = vector.load %arg21[%c0_94, %c0_95] : memref<10x32xf32, #tpu.memory_space<vmem>>, vector<10x32xf32>
    tpu.vector_store %arg21[%c0_94, %c0_95], %234 {strides = array<i32>} : memref<10x32xf32, #tpu.memory_space<vmem>>, vector<10x32xf32>,
    %c1_i32 = arith.constant 1 : i32
    %236 = arith.cmpi eq, %arg0, %c1_i32 : i32
    %237 = arith.extui %236 : i1 to i32
    %c0_i32_96 = arith.constant 0 : i32
    %238 = arith.cmpi ne, %237, %c0_i32_96 : i32
    scf.if %238 {
      %239 = vector.extract_strided_slice %234 {offsets = [0, 0], sizes = [1, 32], strides = [1, 1]} : vector<10x32xf32> to vector<1x32xf32>
      %240 = vector.extract_strided_slice %234 {offsets = [5, 0], sizes = [1, 32], strides = [1, 1]} : vector<10x32xf32> to vector<1x32xf32>
      %241 = tpu.concatenate %239, %240 in 0 : vector<1x32xf32>, vector<1x32xf32> -> vector<2x32xf32>
      %c0_97 = arith.constant 0 : index
      %c0_98 = arith.constant 0 : index
      %242 = vector.load %arg16[%c0_97, %c0_98] : memref<1x32xf32, #tpu.memory_space<vmem>>, vector<1x32xf32>
      %c0_99 = arith.constant 0 : index
      %c0_100 = arith.constant 0 : index
      %243 = vector.load %arg17[%c0_99, %c0_100] : memref<1x32xf32, #tpu.memory_space<vmem>>, vector<1x32xf32>
      %cst_101 = arith.constant dense<0.000000e+00> : vector<2xf32>
      %244 = vector.multi_reduction <add>, %241, %cst_101 [1] : vector<2x32xf32> to vector<2xf32>
      %245 = vector.shape_cast %244 : vector<2xf32> to vector<2x1xf32>
      %cst_102 = arith.constant 3.200000e+01 : f32
      %246 = vector.broadcast %cst_102 : f32 to vector<2x1xf32>
      %247 = arith.divf %245, %246 : vector<2x1xf32>
      %248 = vector.broadcast %247 : vector<2x1xf32> to vector<2x32xf32>
      %249 = arith.subf %241, %248 : vector<2x32xf32>
      %250 = arith.mulf %249, %249 : vector<2x32xf32>
      %cst_103 = arith.constant dense<0.000000e+00> : vector<2xf32>
      %251 = vector.multi_reduction <add>, %250, %cst_103 [1] : vector<2x32xf32> to vector<2xf32>
      %252 = vector.shape_cast %251 : vector<2xf32> to vector<2x1xf32>
      %cst_104 = arith.constant 3.200000e+01 : f32
      %253 = vector.broadcast %cst_104 : f32 to vector<2x1xf32>
      %254 = arith.divf %252, %253 : vector<2x1xf32>
      %cst_105 = arith.constant 9.99999997E-7 : f32
      %255 = vector.broadcast %cst_105 : f32 to vector<2x1xf32>
      %256 = arith.addf %254, %255 : vector<2x1xf32>
      %257 = math.rsqrt %256 : vector<2x1xf32>
      %258 = vector.broadcast %257 : vector<2x1xf32> to vector<2x32xf32>
      %259 = arith.mulf %249, %258 : vector<2x32xf32>
      %260 = vector.broadcast %242 : vector<1x32xf32> to vector<2x32xf32>
      %261 = arith.mulf %259, %260 : vector<2x32xf32>
      %262 = vector.broadcast %243 : vector<1x32xf32> to vector<2x32xf32>
      %263 = arith.addf %261, %262 : vector<2x32xf32>
      %c0_106 = arith.constant 0 : index
      %c0_107 = arith.constant 0 : index
      %264 = vector.load %arg18[%c0_106, %c0_107] : memref<32x10xf32, #tpu.memory_space<vmem>>, vector<32x10xf32>
      %cst_108 = arith.constant dense<0.000000e+00> : vector<2x10xf32>
      %265 = tpu.matmul %263, %264, %cst_108 {dimension_numbers = #tpu.dot_dimension_numbers<[1], [0], [0], [1], [0, 0, 1, 1], [], []>} : vector<2x32xf32>, vector<32x10xf32>, vector<2x10xf32> -> vector<2x10xf32>
      %c0_109 = arith.constant 0 : index
      %c0_110 = arith.constant 0 : index
      %266 = vector.load %arg19[%c0_109, %c0_110] : memref<1x10xf32, #tpu.memory_space<vmem>>, vector<1x10xf32>
      %267 = vector.broadcast %266 : vector<1x10xf32> to vector<2x10xf32>
      %268 = arith.addf %265, %267 : vector<2x10xf32>
      %c0_111 = arith.constant 0 : index
      %c0_112 = arith.constant 0 : index
      %269 = vector.load %arg20[%c0_111, %c0_112] : memref<2x10xf32, #tpu.memory_space<vmem>>, vector<2x10xf32>
      tpu.vector_store %arg20[%c0_111, %c0_112], %268 {strides = array<i32>} : memref<2x10xf32, #tpu.memory_space<vmem>>, vector<2x10xf32>,
    } else {
    }
    return
  }
  func.func @transform_0(%arg0: i32) -> (i32, i32) {
    %c0_i32 = arith.constant 0 : i32
    %c0_i32_0 = arith.constant 0 : i32
    %c0_i32_1 = arith.constant 0 : i32
    return %c0_i32, %c0_i32_0 : i32, i32
  }
  func.func @transform_1(%arg0: i32) -> (i32, i32) {
    %c0_i32 = arith.constant 0 : i32
    %c0_i32_0 = arith.constant 0 : i32
    %c0_i32_1 = arith.constant 0 : i32
    return %c0_i32, %c0_i32_0 : i32, i32
  }
  func.func @transform_2(%arg0: i32) -> (i32, i32) {
    %c0_i32 = arith.constant 0 : i32
    %c0_i32_0 = arith.constant 0 : i32
    %c0_i32_1 = arith.constant 0 : i32
    return %c0_i32, %c0_i32_0 : i32, i32
  }
  func.func @transform_3(%arg0: i32) -> (i32, i32, i32) {
    %c0_i32 = arith.constant 0 : i32
    %c0_i32_0 = arith.constant 0 : i32
    %c0_i32_1 = arith.constant 0 : i32
    return %arg0, %c0_i32, %c0_i32_0 : i32, i32, i32
  }
  func.func @transform_4(%arg0: i32) -> (i32, i32, i32) {
    %c0_i32 = arith.constant 0 : i32
    %c0_i32_0 = arith.constant 0 : i32
    %c0_i32_1 = arith.constant 0 : i32
    return %arg0, %c0_i32, %c0_i32_0 : i32, i32, i32
  }
  func.func @transform_5(%arg0: i32) -> (i32, i32, i32) {
    %c0_i32 = arith.constant 0 : i32
    %c0_i32_0 = arith.constant 0 : i32
    %c0_i32_1 = arith.constant 0 : i32
    return %arg0, %c0_i32, %c0_i32_0 : i32, i32, i32
  }
  func.func @transform_6(%arg0: i32) -> (i32, i32, i32) {
    %c0_i32 = arith.constant 0 : i32
    %c0_i32_0 = arith.constant 0 : i32
    %c0_i32_1 = arith.constant 0 : i32
    return %arg0, %c0_i32, %c0_i32_0 : i32, i32, i32
  }
  func.func @transform_7(%arg0: i32) -> (i32, i32, i32) {
    %c0_i32 = arith.constant 0 : i32
    %c0_i32_0 = arith.constant 0 : i32
    %c0_i32_1 = arith.constant 0 : i32
    return %arg0, %c0_i32, %c0_i32_0 : i32, i32, i32
  }
  func.func @transform_8(%arg0: i32) -> (i32, i32, i32) {
    %c0_i32 = arith.constant 0 : i32
    %c0_i32_0 = arith.constant 0 : i32
    %c0_i32_1 = arith.constant 0 : i32
    return %arg0, %c0_i32, %c0_i32_0 : i32, i32, i32
  }
  func.func @transform_9(%arg0: i32) -> (i32, i32, i32) {
    %c0_i32 = arith.constant 0 : i32
    %c0_i32_0 = arith.constant 0 : i32
    %c0_i32_1 = arith.constant 0 : i32
    return %arg0, %c0_i32, %c0_i32_0 : i32, i32, i32
  }
  func.func @transform_10(%arg0: i32) -> (i32, i32, i32) {
    %c0_i32 = arith.constant 0 : i32
    %c0_i32_0 = arith.constant 0 : i32
    %c0_i32_1 = arith.constant 0 : i32
    return %arg0, %c0_i32, %c0_i32_0 : i32, i32, i32
  }
  func.func @transform_11(%arg0: i32) -> (i32, i32, i32) {
    %c0_i32 = arith.constant 0 : i32
    %c0_i32_0 = arith.constant 0 : i32
    %c0_i32_1 = arith.constant 0 : i32
    return %arg0, %c0_i32, %c0_i32_0 : i32, i32, i32
  }
  func.func @transform_12(%arg0: i32) -> (i32, i32, i32) {
    %c0_i32 = arith.constant 0 : i32
    %c0_i32_0 = arith.constant 0 : i32
    %c0_i32_1 = arith.constant 0 : i32
    return %arg0, %c0_i32, %c0_i32_0 : i32, i32, i32
  }
  func.func @transform_13(%arg0: i32) -> (i32, i32, i32) {
    %c0_i32 = arith.constant 0 : i32
    %c0_i32_0 = arith.constant 0 : i32
    %c0_i32_1 = arith.constant 0 : i32
    return %arg0, %c0_i32, %c0_i32_0 : i32, i32, i32
  }
  func.func @transform_14(%arg0: i32) -> (i32, i32, i32) {
    %c0_i32 = arith.constant 0 : i32
    %c0_i32_0 = arith.constant 0 : i32
    %c0_i32_1 = arith.constant 0 : i32
    return %arg0, %c0_i32, %c0_i32_0 : i32, i32, i32
  }
  func.func @transform_15(%arg0: i32) -> (i32, i32) {
    %c0_i32 = arith.constant 0 : i32
    %c0_i32_0 = arith.constant 0 : i32
    %c0_i32_1 = arith.constant 0 : i32
    return %c0_i32, %c0_i32_0 : i32, i32
  }
  func.func @transform_16(%arg0: i32) -> (i32, i32) {
    %c0_i32 = arith.constant 0 : i32
    %c0_i32_0 = arith.constant 0 : i32
    %c0_i32_1 = arith.constant 0 : i32
    return %c0_i32, %c0_i32_0 : i32, i32
  }
  func.func @transform_17(%arg0: i32) -> (i32, i32) {
    %c0_i32 = arith.constant 0 : i32
    %c0_i32_0 = arith.constant 0 : i32
    %c0_i32_1 = arith.constant 0 : i32
    return %c0_i32, %c0_i32_0 : i32, i32
  }
  func.func @transform_18(%arg0: i32) -> (i32, i32) {
    %c0_i32 = arith.constant 0 : i32
    %c0_i32_0 = arith.constant 0 : i32
    %c0_i32_1 = arith.constant 0 : i32
    return %c0_i32, %c0_i32_0 : i32, i32
  }
  func.func @transform_19(%arg0: i32) -> (i32, i32) {
    %c0_i32 = arith.constant 0 : i32
    %c0_i32_0 = arith.constant 0 : i32
    %c0_i32_1 = arith.constant 0 : i32
    return %c0_i32, %c0_i32_0 : i32, i32
  }
}

</mosaic_0001>

<bundles_post_ra>
// kernel: tile.9
= control target key start
LH: loop header
LB: loop body
LE: loop exit
PB: predicated region body
PF: predicated region fallthrough
CT: control target
= control target key end

     0   :  { %vm3_vm0 = vcmask 261120   ;;  %s34_s0 = inlined_call_operand.vmem [shape: f32[2,5,32], index: 0, kind: input, shape index: {}]   ;;  %s35_s1 = inlined_call_operand.vmem [shape: f32[10,32], index: 1, kind: output, shape index: {}]  }
   0x1   :  { %v2_v0 = vld [vmem:[%s34_s0] sm:$0x1f]   ;;  %v10_v1 = vld [vmem:[%s34_s0 + $0x8] sm:$0x1f]  }
   0x2   :  { %4 = vst.msk [vmem:[%s35_s1] sm:$0x1f] %vm3_vm0, %v2_v0   ;;  %11 = vst.msk [vmem:[%s35_s1 + $0x5] sm:$0x1f] %vm3_vm0, %v10_v1  }

// kernel: vit_forward.1
= control target key start
LH: loop header
LB: loop body
LE: loop exit
PB: predicated region body
PF: predicated region fallthrough
CT: control target
= control target key end

     0   :  { %s4138_s0 = inlined_call_operand.vmem [shape: f32[10,192], index: 0, kind: input, shape index: {}]   ;;  %s4139_s1 = inlined_call_operand.vmem [shape: f32[192,32], index: 1, kind: input, shape index: {}]   ;;  %s4140_s2 = inlined_call_operand.vmem [shape: f32[10,32], index: 2, kind: input, shape index: {}]   ;;  %s4141_s3 = inlined_call_operand.vmem [shape: f32[2,1,32], index: 3, kind: input, shape index: {}]   ;;  %s4142_s4 = inlined_call_operand.vmem [shape: f32[2,1,32], index: 4, kind: input, shape index: {}]   ;;  %s4143_s5 = inlined_call_operand.vmem [shape: f32[2,32,96], index: 5, kind: input, shape index: {}]   ;;  %s4144_s6 = inlined_call_operand.vmem [shape: f32[2,1,96], index: 6, kind: input, shape index: {}]   ;;  %s4145_s7 = inlined_call_operand.vmem [shape: f32[2,32,32], index: 7, kind: input, shape index: {}]   ;;  %s4146_s8 = inlined_call_operand.vmem [shape: f32[2,1,32], index: 8, kind: input, shape index: {}]   ;;  %s4147_s9 = inlined_call_operand.vmem [shape: f32[2,1,32], index: 9, kind: input, shape index: {}]   ;;  %s4148_s10 = inlined_call_operand.vmem [shape: f32[2,1,32], index: 10, kind: input, shape index: {}]   ;;  %s4149_s11 = inlined_call_operand.vmem [shape: f32[2,32,64], index: 11, kind: input, shape index: {}]   ;;  %s4150_s12 = inlined_call_operand.vmem [shape: f32[2,1,64], index: 12, kind: input, shape index: {}]   ;;  %s4151_s13 = inlined_call_operand.vmem [shape: f32[2,64,32], index: 13, kind: input, shape index: {}]   ;;  %s4152_s14 = inlined_call_operand.vmem [shape: f32[2,1,32], index: 14, kind: input, shape index: {}]   ;;  %s4153_s15 = inlined_call_operand.vmem [shape: f32[1,32], index: 15, kind: input, shape index: {}]   ;;  %s4154_s16 = inlined_call_operand.vmem [shape: f32[1,32], index: 16, kind: input, shape index: {}]   ;;  %s4155_s17 = inlined_call_operand.vmem [shape: f32[32,10], index: 17, kind: input, shape index: {}]   ;;  %s4156_s18 = inlined_call_operand.vmem [shape: f32[1,10], index: 18, kind: input, shape index: {}]   ;;  %s4157_s19 = inlined_call_operand.hbm [shape: f32[2,10], index: 19, kind: output, shape index: {}]  }
   0x1   :  { %4163 = sst [smem:[#allocation7_spill]] %s4138_s0 }
   0x2   :  { %4164 = sst [smem:[#allocation8_spill]] %s4139_s1 }
   0x3   :  { %4165 = sst [smem:[#allocation9_spill]] %s4140_s2 }
   0x4   :  { %4166 = sst [smem:[#allocation10_spill]] %s4141_s3 }
   0x5   :  { %4167 = sst [smem:[#allocation11_spill]] %s4143_s5 }
   0x6   :  { %4168 = sst [smem:[#allocation12_spill]] %s4145_s7 }
   0x7   :  { %4169 = sst [smem:[#allocation13_spill]] %s4153_s15 }
   0x8   :  { %4170 = sst [smem:[#allocation14_spill]] %s4154_s16 }
   0x9   :  { %4171 = sst [smem:[#allocation15_spill]] %s4156_s18 }
   0xa   :  { %4172 = sst [smem:[#allocation16_spill]] %s4157_s19 }
   0xb   :  { %24 = vsyncpa [#allocation4], 0  ;;  %s3648_s0 = smov 0  }
   0xc LB: > { %4173 = sst [smem:[#allocation6_spill]] %s3525_s0  ;;  %s3654_s30 = sadd.s32 4294967295, %s3525_s0   ;;  %s3525_s0 = sphi %s3648_s0, %s30_s0  }
   0xd   : > { %p3021_p0 = scmp.ge.s32.totalorder %s3525_s0, 1  ;;  %p627_p1 = scmp.lt.s32.totalorder %s3525_s0, 3 }
   0xf   : > { %p628_p2 = pnand %p3021_p0, %p627_p1 }
  0x10   : > { %p717_p3 = scmp.lt.s32.totalorder (!%p628_p2), %s3654_s30, 1  ;;  %s4175_s5 = sld [smem:[#allocation11_spill]] (!%p628_p2) }
  0x11   : > { %631 = sbr.rel (%p628_p2) target bundleno = 3434 (0xd6a), region = 96  ;;  %s4176_s7 = sld [smem:[#allocation12_spill]] (!%p628_p2) }
  0x12   : > { %p3030_p4 = scmp.ne.s32.totalorder (!%p628_p2), %s3654_s30, 0 }
  0x18   : > { %s3660_s20 = scalar_select %p717_p3, %s3654_s30, 1 }
  0x19   : > { %764 = sbr.rel (%p3030_p4) target bundleno = 297 (0x129), region = 100  ;;  %s4177_s29 = sld [smem:[#allocation8_spill]] (!%p3030_p4)  ;;  %v3527_v3 = vmov (!%p3030_p4), 0.0|0.0   ;;  %vm795_vm0 = vcmask (!%p3030_p4), 523264   ;;  %vm877_vm1 = vcmask (!%p3030_p4), 261120   ;;  %vm879_vm2 = vcmask (!%p3030_p4), 254976  }
  0x1a   : > { %s3090_s3 = sshll.u32 %s3660_s20, 5  ;;  %s741_s16 = scalar_lea.vmem %s4147_s9, %s3660_s20  ;;  %3302 = vmatprep.subr.bf16.mxu0 (!%p3030_p4), %v3527_v3  ;;  %3384 = vmatprep.subr.bf16.mxu1 (!%p3030_p4), %v3527_v3 }
  0x1b   : > { %s3678_s1 = scalar_lea.vmem %s4175_s5, %s3090_s3  ;;  %s3683_s18 = scalar_lea.vmem %s4176_s7, %s3090_s3 }
  0x1c   : > { %s744_s28 = scalar_lea.vmem %s4148_s10, %s3660_s20  ;;  %s3700_s5 = scalar_lea.vmem %s4149_s11, %s3090_s3 }
  0x1d   : > { %s3093_s15 = sshll.u32 %s3660_s20, 6  ;;  %s760_s26 = scalar_lea.vmem %s4152_s14, %s3660_s20 }
  0x1e   : > { %s3710_s23 = scalar_lea.vmem %s4151_s13, %s3093_s15  ;;  %s4178_s2 = sld [smem:[#allocation7_spill]] (!%p3030_p4) }
  0x1f   : > { %v769_v0 = vld [vmem:[%s4177_s29] sm:$0xff] (!%p3030_p4)  ;;  %v770_v1 = vld [vmem:[%s4177_s29 + $0x8] sm:$0xff] (!%p3030_p4)  ;;  %v771_v2 = vld [vmem:[%s4177_s29 + $0x10] sm:$0xff] (!%p3030_p4)  ;;  %s4179_s22 = sld [smem:[#allocation9_spill]] (!%p3030_p4) }
  0x20   : > { %v3303_v4 = vpack.c.bf16 %v770_v1, %v769_v0  ;;  %v772_v5 = vld [vmem:[%s4177_s29 + $0x18] sm:$0xff]  ;;  %v773_v7 = vld [vmem:[%s4177_s29 + $0x20] sm:$0xff]  ;;  %v774_v8 = vld [vmem:[%s4177_s29 + $0x28] sm:$0xff] }
  0x21   : > { %v3306_v6 = vpack.c.bf16 %v772_v5, %v771_v2  ;;  %v3309_v9 = vpack.c.bf16 %v774_v8, %v773_v7  ;;  %v775_v10 = vld [vmem:[%s4177_s29 + $0x30] sm:$0xff]  ;;  %v776_v11 = vld [vmem:[%s4177_s29 + $0x38] sm:$0xff]  ;;  %v777_v15 = vld [vmem:[%s4177_s29 + $0x40] sm:$0xff] }
  0x22   : > { %3304 = vmatpush1.bf16.msra.mxu0 %v3303_v4  ;;  %3396 = vmatpush1.bf16.msra.mxu1 %v3303_v4  ;;  %v3312_v14 = vpack.c.bf16 %v776_v11, %v775_v10  ;;  %v778_v16 = vld [vmem:[%s4177_s29 + $0x48] sm:$0xff]  ;;  %v779_v18 = vld [vmem:[%s4177_s29 + $0x50] sm:$0xff]  ;;  %v780_v19 = vld [vmem:[%s4177_s29 + $0x58] sm:$0xff] }
  0x23   : > { %3305 = vmatprep.subr.bf16.mxu0 %v3527_v3  ;;  %3385 = vmatprep.subr.bf16.mxu1 %v3527_v3  ;;  %v3315_v17 = vpack.c.bf16 %v778_v16, %v777_v15  ;;  %v3318_v20 = vpack.c.bf16 %v780_v19, %v779_v18  ;;  %v781_v21 = vld [vmem:[%s4177_s29 + $0x60] sm:$0xff]  ;;  %v782_v22 = vld [vmem:[%s4177_s29 + $0x68] sm:$0xff]  ;;  %v783_v24 = vld [vmem:[%s4177_s29 + $0x70] sm:$0xff] }
  0x24   : > { %v766_v12 = vld [vmem:[%s4178_s2 + $0x8] sm:$0xff]  ;;  %v768_v13 = vld [vmem:[%s4178_s2 + $0x18] sm:$0x3]  ;;  %v3321_v23 = vpack.c.bf16 %v782_v22, %v781_v21  ;;  %v785_v27 = vld [vmem:[%s4177_s29 + $0x80] sm:$0xff] }
  0x25   : > { %3031 = vmatprep.mubr.msk.f32.mxu0 %vm795_vm0, %v766_v12  ;;  %3032 = vmatprep.mubr.msk.f32.mxu1 %vm795_vm0, %v768_v13  ;;  %v784_v25 = vld [vmem:[%s4177_s29 + $0x78] sm:$0xff]  ;;  %v786_v28 = vld [vmem:[%s4177_s29 + $0x88] sm:$0xff]  ;;  %v787_v30 = vld [vmem:[%s4177_s29 + $0x90] sm:$0xff] }
  0x26   : > { %3307 = vmatpush1.bf16.msra.mxu0 %v3306_v6  ;;  %3397 = vmatpush1.bf16.msra.mxu1 %v3306_v6  ;;  %v3324_v26 = vpack.c.bf16 %v784_v25, %v783_v24  ;;  %v3327_v29 = vpack.c.bf16 %v786_v28, %v785_v27  ;;  %v788_v31 = vld [vmem:[%s4177_s29 + $0x98] sm:$0xff]  ;;  %v789_v33 = vld [vmem:[%s4177_s29 + $0xa0] sm:$0xff]  ;;  %v790_v34 = vld [vmem:[%s4177_s29 + $0xa8] sm:$0xff] }
  0x27   : > { %3308 = vmatprep.subr.bf16.mxu0 %v3527_v3  ;;  %3386 = vmatprep.subr.bf16.mxu1 %v3527_v3  ;;  %v3330_v32 = vpack.c.bf16 %v788_v31, %v787_v30  ;;  %v3333_v35 = vpack.c.bf16 %v790_v34, %v789_v33  ;;  %v791_v36 = vld [vmem:[%s4177_s29 + $0xb0] sm:$0xff]  ;;  %v792_v37 = vld [vmem:[%s4177_s29 + $0xb8] sm:$0xff]  ;;  %v765_v39 = vld [vmem:[%s4178_s2] sm:$0xff] }
  0x28   : > { %v3336_v38 = vpack.c.bf16 %v792_v37, %v791_v36  ;;  %v767_v40 = vld [vmem:[%s4178_s2 + $0x10] sm:$0x3]  ;;  %v793_v41 = vld [vmem:[%s4179_s22] sm:$0xff]  ;;  %v794_v42 = vld [vmem:[%s4179_s22 + $0x8] sm:$0x3] }
  0x2a   : > { %3310 = vmatpush1.bf16.msra.mxu0 %v3309_v9  ;;  %3398 = vmatpush1.bf16.msra.mxu1 %v3309_v9 }
  0x2b   : > { %3311 = vmatprep.subr.bf16.mxu0 %v3527_v3  ;;  %3387 = vmatprep.subr.bf16.mxu1 %v3527_v3 }
  0x2e   : > { %3313 = vmatpush1.bf16.msra.mxu0 %v3312_v14  ;;  %3399 = vmatpush1.bf16.msra.mxu1 %v3312_v14 }
  0x2f   : > { %3314 = vmatprep.subr.bf16.mxu0 %v3527_v3  ;;  %3388 = vmatprep.subr.bf16.mxu1 %v3527_v3 }
  0x32   : > { %3316 = vmatpush1.bf16.msra.mxu0 %v3315_v17  ;;  %3400 = vmatpush1.bf16.msra.mxu1 %v3315_v17 }
  0x33   : > { %3317 = vmatprep.subr.bf16.mxu0 %v3527_v3  ;;  %3389 = vmatprep.subr.bf16.mxu1 %v3527_v3 }
  0x36   : > { %3319 = vmatpush1.bf16.msra.mxu0 %v3318_v20  ;;  %3401 = vmatpush1.bf16.msra.mxu1 %v3318_v20 }
  0x37   : > { %3320 = vmatprep.subr.bf16.mxu0 %v3527_v3  ;;  %3390 = vmatprep.subr.bf16.mxu1 %v3527_v3 }
  0x3a   : > { %3322 = vmatpush1.bf16.msra.mxu0 %v3321_v23  ;;  %3402 = vmatpush1.bf16.msra.mxu1 %v3321_v23 }
  0x3b   : > { %3323 = vmatprep.subr.bf16.mxu0 %v3527_v3  ;;  %3391 = vmatprep.subr.bf16.mxu1 %v3527_v3 }
  0x3e   : > { %3325 = vmatpush1.bf16.msra.mxu0 %v3324_v26  ;;  %3403 = vmatpush1.bf16.msra.mxu1 %v3324_v26 }
  0x3f   : > { %3326 = vmatprep.subr.bf16.mxu0 %v3527_v3  ;;  %3392 = vmatprep.subr.bf16.mxu1 %v3527_v3 }
  0x42   : > { %3328 = vmatpush1.bf16.msra.mxu0 %v3327_v29  ;;  %3404 = vmatpush1.bf16.msra.mxu1 %v3327_v29 }
  0x43   : > { %3329 = vmatprep.subr.bf16.mxu0 %v3527_v3  ;;  %3393 = vmatprep.subr.bf16.mxu1 %v3527_v3 }
  0x46   : > { %3331 = vmatpush1.bf16.msra.mxu0 %v3330_v32  ;;  %3405 = vmatpush1.bf16.msra.mxu1 %v3330_v32 }
  0x47   : > { %3332 = vmatprep.subr.bf16.mxu0 %v3527_v3  ;;  %3394 = vmatprep.subr.bf16.mxu1 %v3527_v3 }
  0x4a   : > { %3334 = vmatpush1.bf16.msra.mxu0 %v3333_v35  ;;  %3406 = vmatpush1.bf16.msra.mxu1 %v3333_v35 }
  0x4b   : > { %3335 = vmatprep.subr.bf16.mxu0 %v3527_v3  ;;  %3395 = vmatprep.subr.bf16.mxu1 %v3527_v3 }
  0x4e   : > { %3337 = vmatpush1.bf16.msra.mxu0 %v3336_v38  ;;  %3407 = vmatpush1.bf16.msra.mxu1 %v3336_v38 }
  0x51   : > { %867 = vmatmul.mubr.f32.vlgmr.msra.gmra.mrb[0].mxu0 %v765_v39  ;;  %872 = vmatmul.mubr.f32.vlgmr.msra.gmra.mrb[0].mxu1 %v767_v40 }
 0x124   : > { %v868_v43 = vpop.f32.mrb[0].mxu0  ;;  %v873_v44 = vpop.f32.mrb[0].mxu1 }
 0x125   : > { %v869_v45 = vadd.f32 %v868_v43, %v793_v41  ;;  %v874_v46 = vadd.f32 %v873_v44, %v794_v42  ;;  %v870_v47 = vpop.f32.mrb[1].mxu0  ;;  %v875_v48 = vpop.f32.mrb[1].mxu1 }
 0x127   : > { %878 = vst.msk [vmem:[#allocation2] sm:$0xff] %vm877_vm1, %v869_v45 }
 0x128   : > { %880 = vst.msk [vmem:[#allocation2 + $0x8] sm:$0x3] %vm879_vm2, %v874_v46 }
 0x129 PF: > { %vm885_vm3 = vcmask 261120   ;;  %vm889_vm4 = vcmask 254976   ;;  %v930_v63 = vld [vmem:[%s3678_s1] sm:$0xff]  ;;  %v931_v0 = vld [vmem:[%s3678_s1 + $0x8] sm:$0xff]  ;;  %v932_v1 = vld [vmem:[%s3678_s1 + $0x10] sm:$0xff]  ;;  %s4180_s3 = sld [smem:[#allocation10_spill]]  ;;  %s4182_s0 = scalar_lea.vmem %s4142_s4, %s3660_s20 }
 0x12a   : > { %v3338_v2 = vpack.c.bf16 %v931_v0, %v930_v63  ;;  %v933_v3 = vld [vmem:[%s3678_s1 + $0x18] sm:$0xff]  ;;  %v3034_v14 = vld [vmem:[%s4182_s0] ss:$0 sm:$0xff]  ;;  %v3528_v21 = vmov 0.0   ;;  %vm3529_vm5 = vmmov 0   ;;  %s4183_s25 = scalar_lea.vmem %s4144_s6, %s3660_s20  ;;  %s3530_s24 = smov 88  }
 0x12b   : > { %v3342_v4 = vpack.c.bf16 %v933_v3, %v932_v1  ;;  %3180 = vmatprep.subr.mxu0 %v3528_v21  ;;  %3182 = vmatprep.mubr.msk.f32.mxu0 %vm3529_vm5, %v3528_v21  ;;  %v3035_v22 = vld [vmem:[%s4183_s25] ss:$0 sm:$0xff]  ;;  %s3531_s27 = smov 96   ;;  %s3534_s1 = smov 80   ;;  %vm1711_vm6 = vcmask 1042432   ;;  %vm1025_vm7 = vcmask 64512  }
 0x12c   : > { %3339 = vmatprep.subr.bf16.mxu1 %v3338_v2  ;;  %s3535_s19 = smov 104   ;;  %s3536_s0 = smov 72   ;;  %vm1101_vm8 = vcmask 36864   ;;  %vm1119_vm9 = vcmask 1044480   ;;  %vm1115_vm10 = vcmask 39936   ;;  %vm1706_vm11 = vcmask 130048  }
 0x12d   : > { %3341 = vmatpush3.bf16.msra.mxu1 %v3338_v2  ;;  %s3537_s15 = smov 64   ;;  %s3538_s7 = smov 48   ;;  %vm1708_vm12 = vcmask 195584   ;;  %vm2654_vm13 = vcmask 523264  }
 0x12e   : > { %v3831_v49 = vld [vmem:[#allocation2] sm:$0xff]  ;;  %3343 = vmatprep.subr.bf16.mxu1 %v3342_v4  ;;  %s3539_s25 = smov 40   ;;  %p3081_p5 = scmp.ne.s32.totalorder %s3654_s30, 1 }
 0x12f   : > { %v3833_v50 = vld [vmem:[#allocation2 + $0x8] sm:$0x3]  ;;  %v886_v51 = vsel %vm885_vm3, %v3831_v49, 0.0  ;;  %s4181_s21 = scalar_lea.vmem %s4180_s3, %s3660_s20  ;;  %s3532_s3 = smov 120   ;;  %vm2747_vm14 = vcmask (!%p3081_p5), 1040384   ;;  %vm3545_vm15 = vmmov (!%p3081_p5), 0  }
 0x130   : > { %887 = vadd.xlane.f32.xlu0 %v886_v51  ;;  %v890_v52 = vsel %vm889_vm4, %v3833_v50, 0.0  ;;  %v3033_v12 = vld [vmem:[%s4181_s21] ss:$0 sm:$0xff]  ;;  %s3533_s21 = smov 112   ;;  %vm2862_vm0 = vcmask (!%p3081_p5), 74752  }
 0x131   : > { %3345 = vmatpush3.bf16.msra.mxu1 %v3342_v4 }
 0x132   : > { %3170 = vmatprep.subr.mxu1 %v3528_v21 }
 0x134   : > { %891 = vadd.xlane.f32.xlu0 %v890_v52 }
 0x1bd   : > { %v888_v53 = vpop.xlane.xlu0 %887 }
 0x1be   : > { %v894_v54 = vmul.f32 0.03125, %v888_v53 }
 0x1c0   : > { %v896_v55 = vsub.f32 %v3831_v49, %v894_v54 }
 0x1c1   : > { %v892_v56 = vpop.xlane.xlu0 %891 }
 0x1c2   : > { %v895_v57 = vmul.f32 0.03125, %v892_v56  ;;  %v898_v58 = vmul.f32 %v896_v55, %v896_v55 }
 0x1c4   : > { %v897_v59 = vsub.f32 %v3833_v50, %v895_v57  ;;  %v900_v60 = vsel %vm885_vm3, %v898_v58, 0.0 }
 0x1c5   : > { %901 = vadd.xlane.f32.xlu1 %v900_v60 }
 0x1c6   : > { %v899_v61 = vmul.f32 %v897_v59, %v897_v59 }
 0x1c8   : > { %v903_v62 = vsel %vm889_vm4, %v899_v61, 0.0 }
 0x1c9   : > { %904 = vadd.xlane.f32.xlu1 %v903_v62 }
 0x252   : > { %v902_v5 = vpop.xlane.xlu1 %901 }
 0x253   : > { %v906_v6 = vmul.f32 0.03125, %v902_v5 }
 0x255   : > { %v908_v7 = vadd.f32 1e-06, %v906_v6 }
 0x256   : > { %v905_v8 = vpop.xlane.xlu1 %904 }
 0x257   : > { %3443 = vrsqrt.f32 %v908_v7  ;;  %v907_v9 = vmul.f32 0.03125, %v905_v8 }
 0x259   : > { %v909_v10 = vadd.f32 1e-06, %v907_v9 }
 0x25b   : > { %3445 = vrsqrt.f32 %v909_v10 }
 0x261   : > { %v3444_v11 = vpop.eup %3443 }
 0x262   : > { %v912_v13 = vmul.f32 %v3444_v11, %v896_v55 }
 0x264   : > { %v920_v15 = vmul.f32 %v3033_v12, %v912_v13 }
 0x265   : > { %v3446_v16 = vpop.eup %3445 }
 0x266   : > { %v913_v17 = vmul.f32 %v3446_v16, %v897_v59  ;;  %v928_v18 = vadd.f32 %v3034_v14, %v920_v15 }
 0x268   : > { %v921_v19 = vmul.f32 %v3033_v12, %v913_v17  ;;  %3167 = vmatprep.mubr.msk.f32.mxu1 %vm885_vm3, %v928_v18 }
 0x26a   : > { %v929_v20 = vadd.f32 %v3034_v14, %v921_v19 }
 0x26c   : > { %3168 = vmatmul.mubr.msk.f32.vlgmr.msra.gmra.mrb[0].mxu1 %vm885_vm3, %v929_v20 }
 0x26d   : > { %3172 = vmatprep.mubr.msk.f32.mxu1 %vm3529_vm5, %v3528_v21 }
 0x33f   : > { %v3169_v23 = vpop.f32.mrb[0].mxu1 }
 0x340   : > { %v1013_v24 = vpop.f32.mrb[1].mxu1  ;;  %v1019_v26 = vadd.f32 %v3169_v23, %v3035_v22 }
 0x341   : > { %v3870_v25 = vadd.f32 %v3035_v22, %v1013_v24 }
 0x342   : > { %v1713_v27 = vrot.slane %v1019_v26, 5 }
 0x343   : > { %1194 = vrot.lane.b32.xlu1 %v3870_v25, %s3530_s24  ;;  %1023 = vrot.lane.b32.xlu0 %v3870_v25, %s3531_s27  ;;  %v1712_v28 = vrot.slane %v3870_v25, 5 }
 0x345   : > { %v3879_v29 = vsel %vm1711_vm6, %v1712_v28, %v1713_v27 }
 0x347   : > { %1192 = vrot.lane.b32.xlu1 %v3870_v25, %s3532_s3  ;;  %1359 = vrot.lane.b32.xlu0 %v3870_v25, %s3533_s21 }
 0x34b   : > { %1361 = vrot.lane.b32.xlu1 %v3870_v25, %s3534_s1  ;;  %1526 = vrot.lane.b32.xlu0 %v3870_v25, %s3535_s19 }
 0x34f   : > { %1528 = vrot.lane.b32.xlu1 %v3870_v25, %s3536_s0  ;;  %1882 = vrot.lane.b32.xlu0 %v3879_v29, %s3530_s24  ;;  %s3540_s24 = smov 56  }
 0x353   : > { %2049 = vrot.lane.b32.xlu0 %v3879_v29, %s3534_s1  ;;  %1715 = vrot.lane.b32.xlu1 %v3879_v29, %s3531_s27  ;;  %s3541_s27 = smov 8  }
 0x357   : > { %2216 = vrot.lane.b32.xlu0 %v3879_v29, %s3536_s0  ;;  %1880 = vrot.lane.b32.xlu1 %v3879_v29, %s3532_s3  ;;  %s3542_s3 = smov 16  }
 0x35b   : > { %2047 = vrot.lane.b32.xlu1 %v3879_v29, %s3533_s21  ;;  %s3543_s21 = smov 24  }
 0x35f   : > { %2214 = vrot.lane.b32.xlu1 %v3879_v29, %s3535_s19  ;;  %s4184_s19 = scalar_lea.vmem %s4146_s8, %s3660_s20 }
 0x3b5   : > { %v1195_v30 = vpop.permute.xlu1 %1194  ;;  %v1024_v31 = vpop.permute.xlu0 %1023 }
 0x3b6   : > { %3171 = vmatpush3.xpose.msk.msra.mxu1 %vm1025_vm7, %v1024_v31  ;;  %3181 = vmatpush3.xpose.msk.msra.mxu0 %vm1025_vm7, %v1195_v30 }
 0x3b7   : > { %3190 = vmatprep.subr.mxu0 %v3528_v21  ;;  %3175 = vmatprep.subr.mxu1 %v3528_v21 }
 0x3b9   : > { %v1193_v32 = vpop.permute.xlu1 %1192  ;;  %3173 = vmatmul.mubr.msk.f32.vlgmr.msra.gmra.mrb[2].mxu1 %vm1025_vm7, %v3870_v25  ;;  %v1360_v33 = vpop.permute.xlu0 %1359 }
 0x3ba   : > { %3183 = vmatmul.mubr.msk.f32.vlgmr.msra.gmra.mrb[0].mxu0 %vm1025_vm7, %v1193_v32  ;;  %3177 = vmatprep.mubr.msk.f32.mxu1 %vm3529_vm5, %v3528_v21 }
 0x3bb   : > { %3192 = vmatprep.mubr.msk.f32.mxu0 %vm3529_vm5, %v3528_v21 }
 0x3bd   : > { %v1362_v34 = vpop.permute.xlu1 %1361  ;;  %v1527_v35 = vpop.permute.xlu0 %1526 }
 0x3be   : > { %3191 = vmatpush3.xpose.msk.msra.mxu0 %vm1025_vm7, %v1362_v34 }
 0x3bf   : > { %3200 = vmatprep.subr.mxu0 %v3528_v21 }
 0x3c1   : > { %v1529_v36 = vpop.permute.xlu1 %1528  ;;  %3193 = vmatmul.mubr.msk.f32.vlgmr.msra.gmra.mrb[2].mxu0 %vm1025_vm7, %v1360_v33  ;;  %v1883_v37 = vpop.permute.xlu0 %1882 }
 0x3c2   : > { %3201 = vmatpush3.xpose.msk.msra.mxu0 %vm1025_vm7, %v1529_v36  ;;  %3202 = vmatprep.mubr.msk.f32.mxu0 %vm3529_vm5, %v3528_v21 }
 0x3c3   : > { %3210 = vmatprep.subr.mxu0 %v3528_v21 }
 0x3c5   : > { %3203 = vmatmul.mubr.msk.f32.vlgmr.msra.gmra.mrb[4].mxu0 %vm1025_vm7, %v1527_v35  ;;  %v1716_v38 = vpop.permute.xlu1 %1715  ;;  %v2050_v40 = vpop.permute.xlu0 %2049 }
 0x3c6   : > { %3211 = vmatpush3.xpose.msk.msra.mxu0 %vm1025_vm7, %v1716_v38  ;;  %3212 = vmatprep.mubr.msk.f32.mxu0 %vm3529_vm5, %v3528_v21 }
 0x3c7   : > { %3220 = vmatprep.subr.mxu0 %v3528_v21 }
 0x3c9   : > { %3213 = vmatmul.mubr.msk.f32.vlgmr.msra.gmra.mrb[6].mxu0 %vm1025_vm7, %v3879_v29  ;;  %v1881_v39 = vpop.permute.xlu1 %1880  ;;  %v2217_v42 = vpop.permute.xlu0 %2216 }
 0x3ca   : > { %3221 = vmatpush3.xpose.msk.msra.mxu0 %vm1025_vm7, %v1883_v37  ;;  %3222 = vmatprep.mubr.msk.f32.mxu0 %vm3529_vm5, %v3528_v21 }
 0x3cb   : > { %3230 = vmatprep.subr.mxu0 %v3528_v21 }
 0x3cd   : > { %3223 = vmatmul.mubr.msk.f32.vlgmr.msra.gmra.mrb[8].mxu0 %vm1025_vm7, %v1881_v39  ;;  %v2048_v41 = vpop.permute.xlu1 %2047 }
 0x3ce   : > { %3231 = vmatpush3.xpose.msk.msra.mxu0 %vm1025_vm7, %v2050_v40  ;;  %3232 = vmatprep.mubr.msk.f32.mxu0 %vm3529_vm5, %v3528_v21 }
 0x3cf   : > { %3240 = vmatprep.subr.mxu0 %v3528_v21 }
 0x3d1   : > { %3233 = vmatmul.mubr.msk.f32.vlgmr.msra.gmra.mrb[10].mxu0 %vm1025_vm7, %v2048_v41  ;;  %v2215_v43 = vpop.permute.xlu1 %2214 }
 0x3d2   : > { %3241 = vmatpush3.xpose.msk.msra.mxu0 %vm1025_vm7, %v2217_v42  ;;  %3242 = vmatprep.mubr.msk.f32.mxu0 %vm3529_vm5, %v3528_v21 }
 0x3d5   : > { %3243 = vmatmul.mubr.msk.f32.vlgmr.msra.gmra.mrb[12].mxu0 %vm1025_vm7, %v2215_v43 }
 0x48c   : > { %v1096_v44 = vpop.f32.mrb[2].mxu1 }
 0x48d   : > { %v1100_v45 = vmul.f32 0.35355338, %v1096_v44  ;;  %v3174_v46 = vpop.f32.mrb[3].mxu1  ;;  %v1266_v47 = vpop.f32.mrb[0].mxu0 }
 0x48e   : > { %v1270_v48 = vmul.f32 0.35355338, %v1266_v47  ;;  %v3184_v51 = vpop.f32.mrb[1].mxu0 }
 0x48f   : > { %v1102_v52 = vsel %vm1101_vm8, %v1100_v45, -inf }
 0x490   : > { %1103 = vmax.xlane.f32.xlu0 %v1102_v52  ;;  %v1271_v53 = vsel %vm1101_vm8, %v1270_v48, -inf }
 0x491   : > { %1272 = vmax.xlane.f32.xlu1 %v1271_v53 }
 0x494   : > { %v1433_v54 = vpop.f32.mrb[2].mxu0 }
 0x495   : > { %v3930_v55 = vmul.f32 0.35355338, %v1433_v54  ;;  %v3194_v56 = vpop.f32.mrb[3].mxu0 }
 0x497   : > { %v1438_v57 = vsel %vm1101_vm8, %v3930_v55, -inf }
 0x498   : > { %v1600_v58 = vpop.f32.mrb[4].mxu0  ;;  %1439 = vmax.xlane.f32.xlu0 %v1438_v57 }
 0x499   : > { %v1604_v59 = vmul.f32 0.35355338, %v1600_v58  ;;  %v3204_v60 = vpop.f32.mrb[5].mxu0 }
 0x49b   : > { %v1605_v61 = vsel %vm1101_vm8, %v1604_v59, -inf }
 0x49c   : > { %1606 = vmax.xlane.f32.xlu0 %v1605_v61  ;;  %v1787_v62 = vpop.f32.mrb[6].mxu0 }
 0x49d   : > { %v1791_v63 = vmul.f32 0.35355338, %v1787_v62  ;;  %v3214_v0 = vpop.f32.mrb[7].mxu0 }
 0x49f   : > { %v1792_v1 = vsel %vm1101_vm8, %v1791_v63, -inf }
 0x4a0   : > { %1793 = vmax.xlane.f32.xlu0 %v1792_v1  ;;  %v1954_v2 = vpop.f32.mrb[8].mxu0 }
 0x4a1   : > { %v1958_v3 = vmul.f32 0.35355338, %v1954_v2  ;;  %v3224_v4 = vpop.f32.mrb[9].mxu0 }
 0x4a3   : > { %v1959_v5 = vsel %vm1101_vm8, %v1958_v3, -inf }
 0x4a4   : > { %1960 = vmax.xlane.f32.xlu1 %v1959_v5  ;;  %v2121_v6 = vpop.f32.mrb[10].mxu0 }
 0x4a5   : > { %v2125_v7 = vmul.f32 0.35355338, %v2121_v6  ;;  %v3234_v8 = vpop.f32.mrb[11].mxu0 }
 0x4a7   : > { %v2126_v9 = vsel %vm1101_vm8, %v2125_v7, -inf }
 0x4a8   : > { %2127 = vmax.xlane.f32.xlu0 %v2126_v9  ;;  %v2288_v10 = vpop.f32.mrb[12].mxu0 }
 0x4a9   : > { %v3244_v11 = vpop.f32.mrb[13].mxu0  ;;  %v2292_v12 = vmul.f32 0.35355338, %v2288_v10 }
 0x4ab   : > { %v2293_v13 = vsel %vm1101_vm8, %v2292_v12, -inf }
 0x4b5   : > { %1113 = vrot.lane.b32.xlu1 %v3870_v25, %s3537_s15 }
 0x4d9   : > { %2294 = vmax.xlane.f32.xlu1 %v2293_v13 }
 0x4ea   : > { %1449 = vrot.lane.b32.xlu1 %v3870_v25, %s3538_s7 }
 0x4ee   : > { %1616 = vrot.lane.b32.xlu1 %v3870_v25, %s3539_s25 }
 0x4f2   : > { %1803 = vrot.lane.b32.xlu1 %v3879_v29, %s3537_s15 }
 0x51d   : > { %v1104_v14 = vpop.xlane.xlu0 %1103 }
 0x51e   : > { %v1105_v15 = vsub.f32 %v1100_v45, %v1104_v14  ;;  %v1273_v16 = vpop.xlane.xlu1 %1272 }
 0x51f   : > { %v1274_v17 = vsub.f32 %v1270_v48, %v1273_v16 }
 0x520   : > { %v1106_v18 = vmul.f32 1.442695, %v1105_v15 }
 0x521   : > { %v1275_v19 = vmul.f32 1.442695, %v1274_v17 }
 0x522   : > { %3447 = vpow2.f32 %v1106_v18 }
 0x523   : > { %3449 = vpow2.f32 %v1275_v19 }
 0x525   : > { %v1440_v20 = vpop.xlane.xlu0 %1439 }
 0x526   : > { %v1441_v35 = vsub.f32 %v3930_v55, %v1440_v20 }
 0x528   : > { %v1442_v37 = vmul.f32 1.442695, %v1441_v35  ;;  %v2400_v35 = vld [vmem:[%s3683_s18] sm:$0xff] }
 0x529   : > { %v1607_v22 = vpop.xlane.xlu0 %1606 }
 0x52a   : > { %v1608_v23 = vsub.f32 %v1604_v59, %v1607_v22 }
 0x52c   : > { %v3945_v24 = vpop.eup %3447  ;;  %v1609_v26 = vmul.f32 1.442695, %v1608_v23 }
 0x52d   : > { %v3947_v27 = vpop.eup %3449  ;;  %v1108_v28 = vsel %vm1101_vm8, %v3945_v24, 0.0  ;;  %v1794_v36 = vpop.xlane.xlu0 %1793 }
 0x52e   : > { %3451 = vpow2.f32 %v1609_v26  ;;  %1109 = vadd.xlane.f32.xlu0 %v1108_v28  ;;  %v1277_v30 = vsel %vm1101_vm8, %v3947_v27, 0.0  ;;  %v1795_v38 = vsub.f32 %v1791_v63, %v1794_v36  ;;  %v2401_v36 = vld [vmem:[%s3683_s18 + $0x8] sm:$0xff] }
 0x52f   : > { %1278 = vadd.xlane.f32.xlu1 %v1277_v30  ;;  %3453 = vpow2.f32 %v1442_v37 }
 0x530   : > { %v1796_v40 = vmul.f32 1.442695, %v1795_v38  ;;  %v3346_v38 = vpack.c.bf16 %v2401_v36, %v2400_v35 }
 0x531   : > { %v1961_v31 = vpop.xlane.xlu1 %1960 }
 0x532   : > { %3455 = vpow2.f32 %v1796_v40  ;;  %v1962_v42 = vsub.f32 %v1958_v3, %v1961_v31  ;;  %3347 = vmatprep.subr.bf16.mxu0 %v3346_v38  ;;  %v2402_v40 = vld [vmem:[%s3683_s18 + $0x10] sm:$0xff] }
 0x533   : > { %3349 = vmatpush3.bf16.msra.mxu0 %v3346_v38 }
 0x534   : > { %v1963_v44 = vmul.f32 1.442695, %v1962_v42 }
 0x535   : > { %v1114_v32 = vpop.permute.xlu1 %1113  ;;  %v2128_v39 = vpop.xlane.xlu0 %2127 }
 0x536   : > { %3176 = vmatpush3.msk.msra.mxu1 %vm1119_vm9, %v1114_v32  ;;  %v2129_v41 = vsub.f32 %v2125_v7, %v2128_v39 }
 0x537   : > { %3185 = vmatprep.subr.mxu1 %v3528_v21 }
 0x538   : > { %v3955_v33 = vpop.eup %3451  ;;  %v2130_v43 = vmul.f32 1.442695, %v2129_v41  ;;  %v2403_v41 = vld [vmem:[%s3683_s18 + $0x18] sm:$0xff] }
 0x539   : > { %v1611_v34 = vsel %vm1101_vm8, %v3955_v33, 0.0  ;;  %v3454_v45 = vpop.eup %3453  ;;  %v3350_v42 = vpack.c.bf16 %v2403_v41, %v2402_v40  ;;  %v2639_v40 = vld [vmem:[%s3710_s23] sm:$0xff]  ;;  %v2640_v41 = vld [vmem:[%s3710_s23 + $0x8] sm:$0xff] }
 0x53a   : > { %1612 = vadd.xlane.f32.xlu1 %v1611_v34  ;;  %3457 = vpow2.f32 %v2130_v43 }
 0x53b   : > { %3459 = vpow2.f32 %v1963_v44  ;;  %3351 = vmatprep.subr.bf16.mxu0 %v3350_v42 }
 0x53c   : > { %v3963_v46 = vpop.eup %3455  ;;  %3353 = vmatpush3.bf16.msra.mxu0 %v3350_v42  ;;  %v3362_v42 = vpack.c.bf16 %v2640_v41, %v2639_v40 }
 0x53d   : > { %v1798_v48 = vsel %vm1101_vm8, %v3963_v46, 0.0 }
 0x53e   : > { %3363 = vmatprep.subr.bf16.mxu0 %v3362_v42 }
 0x544   : > { %1282 = vrot.lane.b32.xlu0 %v3870_v25, %s3540_s24  ;;  %v1444_v25 = vsel %vm1101_vm8, %v3454_v45, 0.0  ;;  %v3967_v51 = vpop.eup %3457 }
 0x545   : > { %v2132_v54 = vsel %vm1101_vm8, %v3967_v51, 0.0  ;;  %v3460_v55 = vpop.eup %3459 }
 0x546   : > { %v1965_v56 = vsel %vm1101_vm8, %v3460_v55, 0.0 }
 0x54b   : > { %1970 = vrot.lane.b32.xlu1 %v3879_v29, %s3540_s24  ;;  %s4188_s24 = sld [smem:[#allocation15_spill]] (!%p3081_p5) }
 0x563   : > { %1445 = vadd.xlane.f32.xlu0 %v1444_v25 }
 0x566   : > { %v2295_v47 = vpop.xlane.xlu1 %2294 }
 0x567   : > { %v2296_v52 = vsub.f32 %v2292_v12, %v2295_v47  ;;  %1799 = vadd.xlane.f32.xlu0 %v1798_v48 }
 0x569   : > { %v2297_v53 = vmul.f32 1.442695, %v2296_v52 }
 0x56a   : > { %v1450_v59 = vpop.permute.xlu1 %1449 }
 0x56b   : > { %3461 = vpow2.f32 %v2297_v53  ;;  %2133 = vadd.xlane.f32.xlu0 %v2132_v54 }
 0x56e   : > { %v1617_v60 = vpop.permute.xlu1 %1616 }
 0x56f   : > { %1966 = vadd.xlane.f32.xlu1 %v1965_v56 }
 0x572   : > { %v1804_v61 = vpop.permute.xlu1 %1803 }
 0x575   : > { %v3972_v57 = vpop.eup %3461 }
 0x576   : > { %v2299_v58 = vsel %vm1101_vm8, %v3972_v57, 0.0 }
 0x577   : > { %2300 = vadd.xlane.f32.xlu0 %v2299_v58 }
 0x580   : > { %2304 = vrot.lane.b32.xlu1 %v3879_v29, %s3539_s25  ;;  %s4185_s25 = scalar_lea.vmem %s4150_s12, %s3660_s20 }
 0x58d   : > { %2137 = vrot.lane.b32.xlu0 %v3879_v29, %s3538_s7 }
 0x5bb   : > { %v1110_v62 = vpop.xlane.xlu0 %1109 }
 0x5bc   : > { %3463 = vrcp.f32 %v1110_v62  ;;  %v1279_v63 = vpop.xlane.xlu1 %1278 }
 0x5bd   : > { %3465 = vrcp.f32 %v1279_v63 }
 0x5bf   : > { %v1283_v3 = vpop.permute.xlu0 %1282 }
 0x5c6   : > { %v3464_v0 = vpop.eup %3463 }
 0x5c7   : > { %v1112_v1 = vmul.f32 %v3464_v0, %v3945_v24  ;;  %v3466_v2 = vpop.eup %3465  ;;  %v1613_v4 = vpop.xlane.xlu1 %1612  ;;  %v3070_v0 = vld [vmem:[%s4184_s19] ss:$0 sm:$0xff] }
 0x5c8   : > { %v1281_v29 = vmul.f32 %v3466_v2, %v3947_v27 }
 0x5c9   : > { %3178 = vmatmul.mubr.msk.f32.vlgmr.msra.gmra.mrb[4].mxu1 %vm1115_vm10, %v1112_v1 }
 0x5ca   : > { %3186 = vmatpush3.msk.msra.mxu1 %vm1119_vm9, %v1283_v3  ;;  %3187 = vmatprep.mubr.msk.f32.mxu1 %vm3529_vm5, %v3528_v21 }
 0x5cb   : > { %3195 = vmatprep.subr.mxu1 %v3528_v21  ;;  %v1971_v7 = vpop.permute.xlu1 %1970 }
 0x5cd   : > { %3188 = vmatmul.mubr.msk.f32.vlgmr.msra.gmra.mrb[6].mxu1 %vm1115_vm10, %v1281_v29 }
 0x5ce   : > { %3196 = vmatpush3.msk.msra.mxu1 %vm1119_vm9, %v1450_v59  ;;  %3197 = vmatprep.mubr.msk.f32.mxu1 %vm3529_vm5, %v3528_v21 }
 0x5cf   : > { %3205 = vmatprep.subr.mxu1 %v3528_v21 }
 0x5f0   : > { %v1446_v5 = vpop.xlane.xlu0 %1445 }
 0x5f1   : > { %3467 = vrcp.f32 %v1446_v5 }
 0x5f2   : > { %3469 = vrcp.f32 %v1613_v4 }
 0x5f4   : > { %v1800_v6 = vpop.xlane.xlu0 %1799 }
 0x5f5   : > { %3471 = vrcp.f32 %v1800_v6 }
 0x5f8   : > { %v2134_v10 = vpop.xlane.xlu0 %2133 }
 0x5fb   : > { %v3468_v8 = vpop.eup %3467 }
 0x5fc   : > { %v1448_v9 = vmul.f32 %v3468_v8, %v3454_v45  ;;  %v1967_v11 = vpop.xlane.xlu1 %1966  ;;  %v3470_v12 = vpop.eup %3469 }
 0x5fd   : > { %3473 = vrcp.f32 %v1967_v11  ;;  %v1615_v13 = vmul.f32 %v3470_v12, %v3955_v33 }
 0x5fe   : > { %3198 = vmatmul.mubr.msk.f32.vlgmr.msra.gmra.mrb[8].mxu1 %vm1115_vm10, %v1448_v9  ;;  %3475 = vrcp.f32 %v2134_v10 }
 0x5ff   : > { %3206 = vmatpush3.msk.msra.mxu1 %vm1119_vm9, %v1617_v60  ;;  %3207 = vmatprep.mubr.msk.f32.mxu1 %vm3529_vm5, %v3528_v21  ;;  %v3472_v14 = vpop.eup %3471 }
 0x600   : > { %3215 = vmatprep.subr.mxu1 %v3528_v21  ;;  %v1802_v15 = vmul.f32 %v3472_v14, %v3963_v46  ;;  %v2305_v23 = vpop.permute.xlu1 %2304 }
 0x602   : > { %3208 = vmatmul.mubr.msk.f32.vlgmr.msra.gmra.mrb[10].mxu1 %vm1115_vm10, %v1615_v13 }
 0x603   : > { %3216 = vmatpush3.msk.msra.mxu1 %vm1119_vm9, %v1804_v61  ;;  %3217 = vmatprep.mubr.msk.f32.mxu1 %vm3529_vm5, %v3528_v21 }
 0x604   : > { %v2301_v16 = vpop.xlane.xlu0 %2300  ;;  %3225 = vmatprep.subr.mxu1 %v3528_v21 }
 0x605   : > { %3477 = vrcp.f32 %v2301_v16  ;;  %v2537_v16 = vld [vmem:[%s3700_s5] sm:$0xff] }
 0x606   : > { %3218 = vmatmul.mubr.msk.f32.vlgmr.msra.gmra.mrb[12].mxu1 %vm1115_vm10, %v1802_v15 }
 0x607   : > { %v3474_v17 = vpop.eup %3473  ;;  %3226 = vmatpush3.msk.msra.mxu1 %vm1119_vm9, %v1971_v7  ;;  %3227 = vmatprep.mubr.msk.f32.mxu1 %vm3529_vm5, %v3528_v21 }
 0x608   : > { %v1969_v18 = vmul.f32 %v3474_v17, %v3460_v55  ;;  %v2138_v19 = vpop.permute.xlu0 %2137  ;;  %3235 = vmatprep.subr.mxu1 %v3528_v21  ;;  %v3476_v20 = vpop.eup %3475  ;;  %v2538_v17 = vld [vmem:[%s3700_s5 + $0x8] sm:$0xff] }
 0x609   : > { %v2136_v22 = vmul.f32 %v3476_v20, %v3967_v51  ;;  %v2540_v20 = vld [vmem:[%s3700_s5 + $0x18] sm:$0xff] }
 0x60a   : > { %3228 = vmatmul.mubr.msk.f32.vlgmr.msra.gmra.mrb[14].mxu1 %vm1115_vm10, %v1969_v18  ;;  %v3354_v18 = vpack.c.bf16 %v2538_v17, %v2537_v16  ;;  %v2779_v17 = vld [vmem:[%s4155_s17 + $0x8] sm:$0xff] (!%p3081_p5) }
 0x60b   : > { %3236 = vmatpush3.msk.msra.mxu1 %vm1119_vm9, %v2138_v19  ;;  %3237 = vmatprep.mubr.msk.f32.mxu1 %vm3529_vm5, %v3528_v21  ;;  %v2539_v19 = vld [vmem:[%s3700_s5 + $0x10] sm:$0xff]  ;;  %s4186_s5 = sld [smem:[#allocation13_spill]] (!%p3081_p5) }
 0x60c   : > { %3245 = vmatprep.subr.mxu1 %v3528_v21 }
 0x60e   : > { %3238 = vmatmul.mubr.msk.f32.vlgmr.msra.gmra.mrb[16].mxu1 %vm1115_vm10, %v2136_v22  ;;  %v3358_v22 = vpack.c.bf16 %v2540_v20, %v2539_v19  ;;  %v3544_v19 = vmov (!%p3081_p5), 0.0|0.0  }
 0x60f   : > { %v3478_v24 = vpop.eup %3477  ;;  %3246 = vmatpush3.msk.msra.mxu1 %vm1119_vm9, %v2305_v23  ;;  %3247 = vmatprep.mubr.msk.f32.mxu1 %vm3529_vm5, %v3528_v21 }
 0x610   : > { %v2303_v26 = vmul.f32 %v3478_v24, %v3972_v57  ;;  %3355 = vmatprep.subr.bf16.mxu1 %v3354_v18 }
 0x612   : > { %3248 = vmatmul.mubr.msk.f32.vlgmr.msra.gmra.mrb[18].mxu1 %vm1115_vm10, %v2303_v26 }
 0x613   : > { %3357 = vmatpush3.bf16.msra.mxu1 %v3354_v18  ;;  %v2780_v18 = vld [vmem:[%s4155_s17 + $0x10] sm:$0xff] (!%p3081_p5) }
 0x614   : > { %3359 = vmatprep.subr.bf16.mxu1 %v3358_v22 }
 0x617   : > { %3361 = vmatpush3.bf16.msra.mxu1 %v3358_v22  ;;  %v2781_v22 = vld [vmem:[%s4155_s17 + $0x18] sm:$0xff] (!%p3081_p5) }
 0x69c   : > { %v1188_v27 = vpop.f32.mrb[4].mxu1 }
 0x69d   : > { %v3179_v28 = vpop.f32.mrb[5].mxu1 }
 0x6a0   : > { %v1355_v30 = vpop.f32.mrb[6].mxu1 }
 0x6a1   : > { %1694 = vrot.lane.b32.xlu0 %v1355_v30, %s3541_s27  ;;  %v3189_v31 = vpop.f32.mrb[7].mxu1 }
 0x6d1   : > { %v1522_v32 = vpop.f32.mrb[8].mxu1 }
 0x6d2   : > { %v3199_v33 = vpop.f32.mrb[9].mxu1 }
 0x6d5   : > { %v1689_v34 = vpop.f32.mrb[10].mxu1 }
 0x6d6   : > { %v3209_v37 = vpop.f32.mrb[11].mxu1 }
 0x6d9   : > { %v1876_v21 = vpop.f32.mrb[12].mxu1 }
 0x6da   : > { %v3219_v39 = vpop.f32.mrb[13].mxu1 }
 0x6dd   : > { %v2043_v43 = vpop.f32.mrb[14].mxu1 }
 0x6de   : > { %2382 = vrot.lane.b32.xlu0 %v2043_v43, %s3541_s27  ;;  %v3229_v44 = vpop.f32.mrb[15].mxu1  ;;  %v2641_v43 = vld [vmem:[%s3710_s23 + $0x10] sm:$0xff] }
 0x6df   : > { %v2642_v44 = vld [vmem:[%s3710_s23 + $0x18] sm:$0xff] }
 0x6e1   : > { %v2210_v45 = vpop.f32.mrb[16].mxu1 }
 0x6e2   : > { %1698 = vrot.lane.b32.xlu0 %v1522_v32, %s3542_s3  ;;  %2386 = vrot.lane.b32.xlu1 %v2210_v45, %s3542_s3  ;;  %v3239_v25 = vpop.f32.mrb[17].mxu1  ;;  %v3073_v32 = vld [vmem:[%s741_s16] ss:$0 sm:$0xff]  ;;  %v3366_v45 = vpack.c.bf16 %v2642_v44, %v2641_v43 }
 0x6e3   : > { %v2643_v25 = vld [vmem:[%s3710_s23 + $0x20] sm:$0xff] }
 0x6e5   : > { %v2377_v46 = vpop.f32.mrb[18].mxu1 }
 0x6e6   : > { %2390 = vrot.lane.b32.xlu1 %v2377_v46, %s3543_s21  ;;  %v3249_v47 = vpop.f32.mrb[19].mxu1  ;;  %v2644_v46 = vld [vmem:[%s3710_s23 + $0x28] sm:$0xff] }
 0x6e7   : > { %v3370_v47 = vpack.c.bf16 %v2644_v46, %v2643_v25 }
 0x6ea   : > { %1702 = vrot.lane.b32.xlu1 %v1689_v34, %s3543_s21  ;;  %v3074_v34 = vld [vmem:[%s744_s28] ss:$0 sm:$0xff]  ;;  %s4187_s28 = sld [smem:[#allocation14_spill]] (!%p3081_p5) }
 0x713   : > { %v1695_v48 = vpop.permute.xlu0 %1694 }
 0x714   : > { %v1705_v58 = vsel %vm1025_vm7, %v1188_v27, %v1695_v48  ;;  %v2645_v48 = vld [vmem:[%s3710_s23 + $0x30] sm:$0xff] }
 0x750   : > { %v2383_v51 = vpop.permute.xlu0 %2382 }
 0x751   : > { %v2393_v53 = vsel %vm1025_vm7, %v1876_v21, %v2383_v51  ;;  %v2646_v51 = vld [vmem:[%s3710_s23 + $0x38] sm:$0xff] }
 0x754   : > { %v2387_v52 = vpop.permute.xlu1 %2386  ;;  %v1699_v56 = vpop.permute.xlu0 %1698 }
 0x755   : > { %v2394_v54 = vsel %vm1706_vm11, %v2393_v53, %v2387_v52  ;;  %v1707_v59 = vsel %vm1706_vm11, %v1705_v58, %v1699_v56  ;;  %v3374_v52 = vpack.c.bf16 %v2646_v51, %v2645_v48  ;;  %v3075_v53 = vld [vmem:[%s4185_s25] ss:$0 sm:$0xff] }
 0x758   : > { %v2391_v55 = vpop.permute.xlu1 %2390 }
 0x759   : > { %v2395_v57 = vsel %vm1708_vm12, %v2394_v54, %v2391_v55 }
 0x75a   : > { %v2397_v60 = vrot.slane %v2395_v57, 3 }
 0x75c   : > { %v1703_v61 = vpop.permute.xlu1 %1702 }
 0x75d   : > { %v1709_v62 = vsel %vm1708_vm12, %v1707_v59, %v1703_v61 }
 0x75e   : > { %v2399_v63 = vsel %vm1119_vm9, %v1709_v62, %v2397_v60 }
 0x75f   : > { %3258 = vmatprep.mubr.msk.f32.mxu0 %vm885_vm3, %v2399_v63 }
 0x760   : > { %3259 = vmatmul.mubr.msk.f32.vlgmr.msra.gmra.mrb[14].mxu0 %vm885_vm3, %v2397_v60 }
 0x761   : > { %3365 = vmatpush3.bf16.msra.mxu0 %v3362_v42 }
 0x762   : > { %3367 = vmatprep.subr.bf16.mxu0 %v3366_v45 }
 0x765   : > { %3369 = vmatpush3.bf16.msra.mxu0 %v3366_v45 }
 0x766   : > { %3371 = vmatprep.subr.bf16.mxu0 %v3370_v47 }
 0x769   : > { %3373 = vmatpush3.bf16.msra.mxu0 %v3370_v47 }
 0x76a   : > { %3375 = vmatprep.subr.bf16.mxu0 %v3374_v52 }
 0x76d   : > { %3377 = vmatpush3.bf16.msra.mxu0 %v3374_v52 }
 0x76e   : > { %3378 = vmatprep.subr.bf16.mxu0 (!%p3081_p5), %v3544_v19 }
 0x833   : > { %v3260_v1 = vpop.f32.mrb[14].mxu0 }
 0x834   : > { %v2488_v2 = vadd.f32 %v3260_v1, %v3070_v0  ;;  %v2482_v3 = vpop.f32.mrb[15].mxu0 }
 0x835   : > { %v2483_v29 = vadd.f32 %v3070_v0, %v2482_v3 }
 0x836   : > { %v4036_v4 = vadd.f32 %v2488_v2, %v3833_v50 }
 0x837   : > { %v4039_v5 = vadd.f32 %v2483_v29, %v3831_v49  ;;  %v3078_v29 = vld [vmem:[%s760_s26] ss:$0 sm:$0xff] }
 0x838   : > { %v2498_v6 = vsel %vm889_vm4, %v4036_v4, 0.0 }
 0x839   : > { %2499 = vadd.xlane.f32.xlu1 %v2498_v6  ;;  %v2495_v7 = vsel %vm885_vm3, %v4039_v5, 0.0 }
 0x83a   : > { %2496 = vadd.xlane.f32.xlu0 %v2495_v7 }
 0x8c6   : > { %v2500_v8 = vpop.xlane.xlu1 %2499 }
 0x8c7   : > { %v2502_v9 = vmul.f32 0.03125, %v2500_v8  ;;  %v2497_v10 = vpop.xlane.xlu0 %2496 }
 0x8c8   : > { %v2501_v50 = vmul.f32 0.03125, %v2497_v10 }
 0x8c9   : > { %v2504_v11 = vsub.f32 %v4036_v4, %v2502_v9 }
 0x8ca   : > { %v2503_v49 = vsub.f32 %v4039_v5, %v2501_v50 }
 0x8cb   : > { %v2506_v14 = vmul.f32 %v2504_v11, %v2504_v11 }
 0x8cc   : > { %v2505_v12 = vmul.f32 %v2503_v49, %v2503_v49 }
 0x8cd   : > { %v2510_v15 = vsel %vm889_vm4, %v2506_v14, 0.0 }
 0x8ce   : > { %v2507_v13 = vsel %vm885_vm3, %v2505_v12, 0.0 }
 0x8cf   : > { %2508 = vadd.xlane.f32.xlu0 %v2507_v13 }
 0x8d3   : > { %2511 = vadd.xlane.f32.xlu0 %v2510_v15 }
 0x95c   : > { %v2509_v23 = vpop.xlane.xlu0 %2508 }
 0x95d   : > { %v2513_v24 = vmul.f32 0.03125, %v2509_v23  ;;  %v3546_v23 = vmov (!%p3081_p5), 0.0  }
 0x95f   : > { %v2515_v26 = vadd.f32 1e-06, %v2513_v24  ;;  %v3382_v24 = vpack.c.bf16 (!%p3081_p5), %v2781_v22, %v2780_v18 }
 0x960   : > { %v2512_v27 = vpop.xlane.xlu0 %2511 }
 0x961   : > { %3479 = vrsqrt.f32 %v2515_v26  ;;  %v2514_v28 = vmul.f32 0.03125, %v2512_v27 }
 0x963   : > { %v2516_v30 = vadd.f32 1e-06, %v2514_v28 }
 0x965   : > { %3481 = vrsqrt.f32 %v2516_v30 }
 0x96b   : > { %v3480_v31 = vpop.eup %3479 }
 0x96c   : > { %v2519_v33 = vmul.f32 %v3480_v31, %v2503_v49  ;;  %v3082_v31 = vld [vmem:[%s4186_s5] ss:$0 sm:$0xff] (!%p3081_p5) }
 0x96e   : > { %v2527_v35 = vmul.f32 %v3073_v32, %v2519_v33  ;;  %v3083_v33 = vld [vmem:[%s4187_s28] ss:$0 sm:$0xff] (!%p3081_p5) }
 0x96f   : > { %v3482_v36 = vpop.eup %3481 }
 0x970   : > { %v2520_v37 = vmul.f32 %v3482_v36, %v2504_v11  ;;  %v2535_v38 = vadd.f32 %v3074_v34, %v2527_v35  ;;  %v3084_v36 = vld [vmem:[%s4188_s24] ss:$0 sm:$0xff] (!%p3081_p5) }
 0x972   : > { %v2528_v21 = vmul.f32 %v3073_v32, %v2520_v37  ;;  %3269 = vmatprep.mubr.msk.f32.mxu1 %vm885_vm3, %v2535_v38 }
 0x974   : > { %v2536_v39 = vadd.f32 %v3074_v34, %v2528_v21 }
 0x976   : > { %3270 = vmatmul.mubr.msk.f32.vlgmr.msra.gmra.mrb[20].mxu1 %vm885_vm3, %v2536_v39 }
 0xa49   : > { %v3271_v54 = vpop.f32.mrb[20].mxu1 }
 0xa4a   : > { %v2626_v55 = vadd.f32 %v3271_v54, %v3075_v53  ;;  %v2620_v56 = vpop.f32.mrb[21].mxu1 }
 0xa4b   : > { %v2621_v57 = vadd.f32 %v3075_v53, %v2620_v56 }
 0xa4c   : > { %v2632_v58 = vmul.f32 0.70710677, %v2626_v55  ;;  %v2630_v1 = vmul.f32 0.5, %v2626_v55 }
 0xa4d   : > { %v2631_v59 = vmul.f32 0.70710677, %v2621_v57  ;;  %v2629_v63 = vmul.f32 0.5, %v2621_v57 }
 0xa4e   : > { %3483 = verf.f32 %v2632_v58 }
 0xa4f   : > { %3485 = verf.f32 %v2631_v59 }
 0xa58   : > { %v3484_v60 = vpop.eup %3483 }
 0xa59   : > { %v3486_v61 = vpop.eup %3485  ;;  %v2636_v62 = vadd.f32 1.0, %v3484_v60 }
 0xa5a   : > { %v2635_v0 = vadd.f32 1.0, %v3486_v61 }
 0xa5b   : > { %v2638_v3 = vmul.f32 %v2636_v62, %v2630_v1 }
 0xa5c   : > { %v2637_v2 = vmul.f32 %v2635_v0, %v2629_v63 }
 0xa5e   : > { %3288 = vmatprep.mubr.msk.f32.mxu0 %vm2654_vm13, %v2637_v2 }
 0xa5f   : > { %3289 = vmatmul.mubr.msk.f32.vlgmr.msra.gmra.mrb[16].mxu0 %vm2654_vm13, %v2638_v3 }
 0xa60   : > { %3299 = vmatprep.mubr.msk.f32.mxu0 (!%p3081_p5), %vm3545_vm15, %v3546_v23 }
 0xb32   : > { %v3290_v6 = vpop.f32.mrb[16].mxu0  ;;  %2743 = sbr.rel (%p3081_p5) target bundleno = 3403 (0xd4b), region = 104 }
 0xb33   : > { %v2733_v7 = vadd.f32 %v3290_v6, %v3078_v29  ;;  %v2727_v8 = vpop.f32.mrb[17].mxu0 }
 0xb34   : > { %v2728_v9 = vadd.f32 %v3078_v29, %v2727_v8 }
 0xb35   : > { %v2737_v10 = vadd.f32 %v2733_v7, %v4036_v4 }
 0xb36   : > { %v2736_v50 = vadd.f32 %v2728_v9, %v4039_v5  ;;  %v2778_v5 = vld [vmem:[%s4155_s17] sm:$0xff] (!%p3081_p5) }
 0xb37   : > { %2739 = vst.msk [vmem:[#allocation2 + $0x8] sm:$0x3] %vm889_vm4, %v2737_v10  ;;  %v3379_v20 = vpack.c.bf16 (!%p3081_p5), %v2779_v17, %v2778_v5 }
 0xb38   : > { %2738 = vst.msk [vmem:[#allocation2] sm:$0xff] %vm885_vm3, %v2736_v50  ;;  %v2745_v11 = vrot.slane (!%p3081_p5), %v2736_v50, 4 }
 0xb39   : > { %3380 = vmatpush3.bf16.msra.mxu0 %v3379_v20 }
 0xb3a   : > { %v2748_v49 = vsel %vm2747_vm14, %v2736_v50, %v2745_v11  ;;  %3381 = vmatprep.subr.bf16.mxu0 %v3544_v19 }
 0xb3b   : > { %v2751_v12 = vsel %vm889_vm4, %v2748_v49, 0.0 }
 0xb3c   : > { %2752 = vadd.xlane.f32.xlu0 %v2751_v12 }
 0xb3d   : > { %3383 = vmatpush3.bf16.msra.mxu0 %v3382_v24 }
 0xbc9   : > { %v2753_v13 = vpop.xlane.xlu0 %2752 }
 0xbca   : > { %v2754_v14 = vmul.f32 0.03125, %v2753_v13 }
 0xbcc   : > { %v2755_v15 = vsub.f32 %v2748_v49, %v2754_v14 }
 0xbce   : > { %v2756_v16 = vmul.f32 %v2755_v15, %v2755_v15 }
 0xbd0   : > { %v2757_v4 = vsel %vm889_vm4, %v2756_v16, 0.0 }
 0xbd1   : > { %2758 = vadd.xlane.f32.xlu0 %v2757_v4 }
 0xc5e   : > { %v2759_v26 = vpop.xlane.xlu0 %2758 }
 0xc5f   : > { %v2760_v27 = vmul.f32 0.03125, %v2759_v26 }
 0xc61   : > { %v2761_v28 = vadd.f32 1e-06, %v2760_v27 }
 0xc63   : > { %3487 = vrsqrt.f32 %v2761_v28 }
 0xc6d   : > { %v3488_v30 = vpop.eup %3487 }
 0xc6e   : > { %v2763_v32 = vmul.f32 %v3488_v30, %v2755_v15 }
 0xc70   : > { %v2770_v34 = vmul.f32 %v3082_v31, %v2763_v32 }
 0xc72   : > { %v2777_v35 = vadd.f32 %v3083_v33, %v2770_v34 }
 0xc74   : > { %3300 = vmatmul.mubr.msk.f32.vlgmr.msra.gmra.mrb[0].mxu0 %vm885_vm3, %v2777_v35 }
 0xd47   : > { %v2858_v37 = vpop.f32.mrb[0].mxu0 }
 0xd48   : > { %v2859_v38 = vadd.f32 %v3084_v36, %v2858_v37  ;;  %v3301_v21 = vpop.f32.mrb[1].mxu0 }
 0xd4a   : > { %2863 = vst.msk [vmem:[#allocation3] sm:$0x3] %vm2862_vm0, %v2859_v38 }
 0xd4b PF: > { %p3412_p6 = scmp.eq.s32.totalorder %s3654_s30, 1  ;;  %s3547_s20 = smov [#allocation3]  }
 0xd4c   : > { %s2871_s26 = sshll.u32 %s3547_s20, 4  ;;  %s2872_s26 = int_to_ptr.vmem [resolvable:$true] %s2871_s26 }
 0xd4d   : > { %s3489_s27 = scalar_lea.vmem %s2872_s26, 32  ;;  %p3496_p10 = scmp.lt.s32.totalorder %s2872_s26, %s2872_s26 }
 0xd4e   : > { %p3490_p7 = scmp.ne.s32.totalorder %s2872_s26, %s3489_s27  ;;  %p3497_p11 = scmp.lt.s32.totalorder %s3489_s27, %s3489_s27 }
 0xd50   : > { %p3491_p8 = pnand %p3490_p7, %p3412_p6  ;;  %p3498_p12 = por %p3497_p11, %p3496_p10 }
 0xd52   : > { %p3492_p9 = pneg %p3491_p8 }
 0xd54   : > { %p3499_p13 = pnand %p3498_p12, %p3492_p9 }
 0xd56   : > { %3502 = shalt.err (!%p3499_p13)
}
 0xd57   : > { %s4189_s18 = sld [smem:[#allocation16_spill]] }
 0xd5d   : > { %s3503_s1 = scalar_lea.hbm %s4189_s18, 32 }
 0xd5e   : > { %p3504_p0 = scmp.ne.s32.totalorder %s4189_s18, %s3503_s1  ;;  %p3509_p3 = scmp.lt.u32.totalorder %s3503_s1, %s4189_s18 }
 0xd60   : > { %p3505_p1 = pnand %p3504_p0, %p3412_p6 }
 0xd62   : > { %p3506_p2 = pneg %p3505_p1 }
 0xd64   : > { %p3511_p4 = pnand %p3509_p3, %p3506_p2 }
 0xd66   : > { %3514 = shalt.err (!%p3511_p4)
}
 0xd67   : > { %3409 = dma.vmem_to_hbm [thread:$0]  (%p3412_p6), %s2872_s26, 32, %s4189_s18, [#allocation4]  }
 0xd68   : > { %3520 = dma.done.wait (%p3412_p6), [#allocation4], 32  }
 0xd69   : > { %3522 = vsyncadd (%p3412_p6), [#allocation4], 4294967264 }
 0xd6a PF: > { %s4190_s28 = sld [smem:[#allocation6_spill]] }
 0xd70   : > { %s30_s0 = sadd.s32 1, %s4190_s28  }
 0xd71   : > { %p27_p5 = scmp.ge.s32.totalorder %s30_s0, 4  }
 0xd73   :  { %29 = sbr.rel (!%p27_p5) target bundleno = 12 (0xc), region = 164 }
 0xd7a   :  { %2884 = vsyncpa [#allocation4], 1 }
 0xd7b   :  { %2886 = vsyncpa [#allocation4 + $0x1], 1 }

</bundles_post_ra>
